<compile_context>
chip_gen: v7x
topology: tpu7x:2x2x1
jax: 0.10.0
libtpu: 0.0.40
codegen_flags: <defaults>
</compile_context>

<pallas_src>
import functools
import math

import jax
import jax.numpy as jnp
from jax import lax
from jax.experimental import pallas as pl
from jax.experimental.pallas import tpu as pltpu


_LANE = 128
_SINGLE_BUFFER_WEIGHTS = True   # flipped off at runtime iff pl.Buffered(1) is rejected


def _round_up(n, m):
    return ((n + m - 1) // m) * m


def _vmem_capacity_bytes():
    try:
        info = pltpu.get_tpu_info()
        for attr in ("vmem_capacity_bytes", "vmem_bytes", "vmem_size_bytes"):
            v = getattr(info, attr, None)
            if v:
                return int(v)
    except Exception:
        pass
    return 64 * 2**20   # conservative default (v7x per-TensorCore VMEM)


def _const_spec(shape, grid_ndim):
    """Whole array VMEM-resident: constant block index; single-buffered when possible."""
    nd = len(shape)
    if grid_ndim == 1:
        idx = lambda i, a, _nd=nd: (0,) * _nd
    else:
        idx = lambda i, j, a, _nd=nd: (0,) * _nd
    if _SINGLE_BUFFER_WEIGHTS:
        try:
            return pl.BlockSpec(shape, idx, pipeline_mode=pl.Buffered(1))
        except Exception:   # pipeline_mode / Buffered not supported by this jax build
            pass
    return pl.BlockSpec(shape, idx)


# ----------------------------- shared block compute ------------------------------

def _ln_mlp_block(h, g, b, w1, b1, w2, b2, alpha, *, h_real, mask):
    """One pre-LN residual MLP block on an f32 (tm, H_pad) activation tile."""
    inv_h = 1.0 / float(h_real)
    mu = jnp.sum(h, axis=-1, keepdims=True) * inv_h        # padded cols are exactly 0
    d = h - mu
    if mask is not None:                                    # static branch: H padded
        d = jnp.where(mask, d, 0.0)
    var = jnp.sum(d * d, axis=-1, keepdims=True) * inv_h
    u = d * lax.rsqrt(var + 1e-5) * g + b
    z = jnp.dot(u.astype(jnp.bfloat16), w1, preferred_element_type=jnp.float32) + b1
    # GELU (tanh approximation).
    # TODO(synk): core.ResidualMLP activation unverified (torch nn.GELU defaults to erf).
    z = 0.5 * z * (1.0 + jnp.tanh(0.7978845608028654 * (z + 0.044715 * z * z * z)))
    z = jnp.dot(z.astype(jnp.bfloat16), w2, preferred_element_type=jnp.float32) + b2
    return alpha * h + z                                    # dropout = identity (eval)


# ----------------------------- kernels ------------------------------

def _resident_kernel(alpha_ref,                        # SMEM (NB,) f32 (scalar prefetch)
                     x_ref,                            # (tm, Dp) bf16
                     w_in_ref, b_in_ref,               # (Dp, Hp) bf16 ; (1, Hp) f32
                     ln_g_ref, ln_b_ref,               # (NB, 1, Hp) f32
                     w1_ref, b1_ref, w2_ref, b2_ref,   # (NB, Hp, Hp) bf16 ; (NB, 1, Hp) f32
                     w_out_ref, b_out_ref,             # (Hp, Dp) bf16 ; (1, Dp) f32
                     o_ref,                            # (tm, Dp) f32
                     *, num_blocks, h_real, d_real):
    h_pad = w_in_ref.shape[1]
    h = jnp.dot(x_ref[...], w_in_ref[...],
                preferred_element_type=jnp.float32) + b_in_ref[...]

    mask = None
    if h_real != h_pad:   # hoisted once (not per block)
        mask = lax.broadcasted_iota(jnp.int32, (1, h_pad), 1) < h_real

    def body(j, h):
        return _ln_mlp_block(h, ln_g_ref[j], ln_b_ref[j],
                             w1_ref[j], b1_ref[j], w2_ref[j], b2_ref[j],
                             alpha_ref[j], h_real=h_real, mask=mask)

    h = lax.fori_loop(0, num_blocks, body, h)

    y = jnp.dot(h.astype(jnp.bfloat16), w_out_ref[...],
                preferred_element_type=jnp.float32) + b_out_ref[...]
    # simplex tangent projection: zero mean over the REAL data_dim features
    y = y - jnp.sum(y, axis=-1, keepdims=True) * (1.0 / float(d_real))
    o_ref[...] = y.astype(o_ref.dtype)


def _streamed_kernel(alpha_ref,                        # SMEM (NB,) f32 (scalar prefetch)
                     x_ref,                            # (tm, Dp) bf16
                     w_in_ref, b_in_ref,               # resident
                     ln_g_ref, ln_b_ref,               # (1, 1, Hp) f32   (block j)
                     w1_ref, b1_ref, w2_ref, b2_ref,   # (1, Hp, Hp) bf16 ; (1, 1, Hp) f32
                     w_out_ref, b_out_ref,             # resident
                     o_ref,                            # (tm, Dp) f32
                     h_ref,                            # VMEM scratch (tm, Hp) f32
                     *, num_blocks, h_real, d_real):
    j = pl.program_id(1)
    h_pad = h_ref.shape[1]

    @pl.when(j == 0)
    def _():   # input projection once per row tile
        h_ref[...] = jnp.dot(x_ref[...], w_in_ref[...],
                             preferred_element_type=jnp.float32) + b_in_ref[...]

    mask = None
    if h_real != h_pad:
        mask = lax.broadcasted_iota(jnp.int32, (1, h_pad), 1) < h_real

    h = _ln_mlp_block(h_ref[...], ln_g_ref[0], ln_b_ref[0],
                      w1_ref[0], b1_ref[0], w2_ref[0], b2_ref[0],
                      alpha_ref[j], h_real=h_real, mask=mask)
    h_ref[...] = h

    @pl.when(j == num_blocks - 1)
    def _():   # output projection + simplex projection once per row tile
        y = jnp.dot(h.astype(jnp.bfloat16), w_out_ref[...],
                    preferred_element_type=jnp.float32) + b_out_ref[...]
        y = y - jnp.sum(y, axis=-1, keepdims=True) * (1.0 / float(d_real))
        o_ref[...] = y.astype(o_ref.dtype)


# ----------------------------- parameters ------------------------------

def init_params(key, *, data_dim, hidden_dim, num_blocks):
    D, H, NB = data_dim, hidden_dim, num_blocks
    ks = jax.random.split(key, 2 + 2 * NB)

    def nrm(k, shape, scale=0.02):
        return scale * jax.random.normal(k, shape, dtype=jnp.float32)

    return dict(
        w_in=nrm(ks[0], (D, H)),
        b_in=jnp.zeros((H,), jnp.float32),
        ln_g=jnp.ones((NB, H), jnp.float32),
        ln_b=jnp.zeros((NB, H), jnp.float32),
        w1=jnp.stack([nrm(ks[2 + 2 * j], (H, H)) for j in range(NB)]),
        b1=jnp.zeros((NB, H), jnp.float32),
        w2=jnp.stack([nrm(ks[3 + 2 * j], (H, H)) for j in range(NB)]),
        b2=jnp.zeros((NB, H), jnp.float32),
        w_out=nrm(ks[1], (H, D)),
        b_out=jnp.zeros((D,), jnp.float32),
        alpha=jnp.ones((NB,), jnp.float32),
    )


# ----------------------------- forward ------------------------------

def simplex_residual_mlp(params, x, *, learnable_skip=True, weight_streaming=None):
    orig_shape = x.shape
    D = orig_shape[-1]
    M = int(math.prod(orig_shape[:-1]))
    H = params['w_in'].shape[1]
    NB = params['w1'].shape[0]

    Dp = _round_up(D, _LANE)
    Hp = _round_up(H, _LANE)

    # ---- lane-dense zero padding of activations & parameters (exactness preserved) ----
    x2 = x.reshape(M, D).astype(jnp.bfloat16)
    if Dp != D:
        x2 = jnp.pad(x2, ((0, 0), (0, Dp - D)))

    def pad2(a, r, c):
        return jnp.pad(a, ((0, r - a.shape[0]), (0, c - a.shape[1])))

    def pad_rows(a, c):            # (NB, n) -> (NB, 1, c)
        return jnp.pad(a, ((0, 0), (0, c - a.shape[1])))[:, None, :]

    w_in = pad2(params['w_in'], Dp, Hp).astype(jnp.bfloat16)
    b_in = jnp.pad(params['b_in'], (0, Hp - H))[None, :]
    ln_g = pad_rows(params['ln_g'], Hp)
    ln_b = pad_rows(params['ln_b'], Hp)
    w1 = jnp.pad(params['w1'], ((0, 0), (0, Hp - H), (0, Hp - H))).astype(jnp.bfloat16)
    w2 = jnp.pad(params['w2'], ((0, 0), (0, Hp - H), (0, Hp - H))).astype(jnp.bfloat16)
    b1 = pad_rows(params['b1'], Hp)
    b2 = pad_rows(params['b2'], Hp)
    w_out = pad2(params['w_out'], Hp, Dp).astype(jnp.bfloat16)
    b_out = jnp.pad(params['b_out'], (0, Dp - D))[None, :]
    alpha = params['alpha'] if learnable_skip else jnp.ones_like(params['alpha'])

    # ---- row tiling: big tiles, >=2 "parallel" grid steps when M allows (v7x 2 TCs) ----
    gran = 16                       # bf16 input: native (16,128) sublane packing
    tm = min(512, _round_up(M, gran))
    if M >= 2 * gran and pl.cdiv(M, tm) < 2:
        tm = _round_up(pl.cdiv(M, 2), gran)
    M_pad = _round_up(M, tm)
    if M_pad != M:
        x2 = jnp.pad(x2, ((0, M_pad - M), (0, 0)))   # zero rows are LayerNorm-safe
    n_row_tiles = M_pad // tm

    # ---- VMEM budgeting from real footprints, clamped to this generation's capacity ----
    cap = _vmem_capacity_bytes()
    block_w_bytes = 2 * NB * Hp * Hp * 2                                   # w1+w2 (bf16)
    small_w_bytes = 2 * Dp * Hp * 2 + (4 * NB * Hp + Hp + Dp) * 4 + NB * 4
    tile_bytes = 2 * (tm * Dp * 2 + tm * Dp * 4)                           # dbl-buffered io
    live_bytes = 6 * tm * Hp * 4                                           # h, u, z, casts
    resident_need = block_w_bytes + small_w_bytes + tile_bytes + live_bytes
    streamed_need = (2 * (2 * Hp * Hp * 2 + 4 * Hp * 4) + small_w_bytes
                     + tile_bytes + live_bytes + tm * Hp * 4)

    if weight_streaming is None:    # resident by default; stream when weights won't fit
        weight_streaming = resident_need > int(0.75 * cap)

    need = streamed_need if weight_streaming else resident_need
    vmem_limit = int(min(int(0.85 * cap), max(32 * 2**20, int(1.3 * need) + (4 << 20))))

    out_shape = jax.ShapeDtypeStruct((M_pad, Dp), jnp.float32)
    kernel_kwargs = dict(num_blocks=NB, h_real=H, d_real=D)

    if not weight_streaming:
        row_in = pl.BlockSpec((tm, Dp), lambda i, a: (i, 0))
        row_out = pl.BlockSpec((tm, Dp), lambda i, a: (i, 0))
        in_specs = [row_in,
                    _const_spec(w_in.shape, 1), _const_spec(b_in.shape, 1),
                    _const_spec(ln_g.shape, 1), _const_spec(ln_b.shape, 1),
                    _const_spec(w1.shape, 1), _const_spec(b1.shape, 1),
                    _const_spec(w2.shape, 1), _const_spec(b2.shape, 1),
                    _const_spec(w_out.shape, 1), _const_spec(b_out.shape, 1)]
        grid = (n_row_tiles,)
        scratch = []
        kernel = functools.partial(_resident_kernel, **kernel_kwargs)
        semantics = ("parallel",)
    else:
        row_in = pl.BlockSpec((tm, Dp), lambda i, j, a: (i, 0))
        row_out = pl.BlockSpec((tm, Dp), lambda i, j, a: (i, 0))

        def blk(shape):   # stream one residual block's params per grid step j
            nd = len(shape)
            return pl.BlockSpec((1,) + tuple(shape[1:]),
                                lambda i, j, a, _nd=nd: (j,) + (0,) * (_nd - 1))

        in_specs = [row_in,
                    _const_spec(w_in.shape, 2), _const_spec(b_in.shape, 2),
                    blk(ln_g.shape), blk(ln_b.shape),
                    blk(w1.shape), blk(b1.shape),
                    blk(w2.shape), blk(b2.shape),
                    _const_spec(w_out.shape, 2), _const_spec(b_out.shape, 2)]
        grid = (n_row_tiles, NB)
        scratch = [pltpu.VMEM((tm, Hp), jnp.float32)]      # residual-stream carry
        kernel = functools.partial(_streamed_kernel, **kernel_kwargs)
        semantics = ("parallel", "arbitrary")

    out = pl.pallas_call(
        kernel,
        out_shape=out_shape,
        grid_spec=pltpu.PrefetchScalarGridSpec(
            num_scalar_prefetch=1,             # alpha -> SMEM scalars
            grid=grid,
            in_specs=in_specs,
            out_specs=row_out,
            scratch_shapes=scratch),
        compiler_params=pltpu.CompilerParams(
            dimension_semantics=semantics,
            vmem_limit_bytes=vmem_limit),
    )(alpha, x2, w_in, b_in, ln_g, ln_b, w1, b1, w2, b2, w_out, b_out)

    return out[:M, :D].reshape(orig_shape)


# ----------------------------- pure-JAX reference ------------------------------

def _reference(params, x, *, learnable_skip=True):
    # TODO(synk): simpwrap.SimplexModel internals unverified; assumed: run the core
    # ResidualMLP on the simplex-valued input and center the output per feature vector.
    D = x.shape[-1]
    M = int(math.prod(x.shape[:-1]))
    xv = x.reshape(M, D).astype(jnp.bfloat16)
    h = jnp.dot(xv, params['w_in'].astype(jnp.bfloat16),
                preferred_element_type=jnp.float32) + params['b_in'][None, :]
    NB = params['w1'].shape[0]
    alpha = params['alpha'] if learnable_skip else jnp.ones_like(params['alpha'])
    for j in range(NB):
        mu = jnp.mean(h, -1, keepdims=True)
        var = jnp.mean(jnp.square(h - mu), -1, keepdims=True)
        u = (h - mu) * lax.rsqrt(var + 1e-5) * params['ln_g'][j] + params['ln_b'][j]
        z = jnp.dot(u.astype(jnp.bfloat16), params['w1'][j].astype(jnp.bfloat16),
                    preferred_element_type=jnp.float32) + params['b1'][j]
        z = 0.5 * z * (1.0 + jnp.tanh(0.7978845608028654 * (z + 0.044715 * z * z * z)))
        z = jnp.dot(z.astype(jnp.bfloat16), params['w2'][j].astype(jnp.bfloat16),
                    preferred_element_type=jnp.float32) + params['b2'][j]
        h = alpha[j] * h + z
    y = jnp.dot(h.astype(jnp.bfloat16), params['w_out'].astype(jnp.bfloat16),
                preferred_element_type=jnp.float32) + params['b_out'][None, :]
    y = y - jnp.mean(y, -1, keepdims=True)
    return y.reshape(x.shape)


# ----------------------------- main ------------------------------

def _run_with_fallback(fn, *args):
    """Run the jitted forward; if pl.Buffered(1) single-buffering is rejected by this
    jax/libtpu build, fall back to default double-buffered weight specs and retry."""
    global _SINGLE_BUFFER_WEIGHTS
    try:
        out = fn(*args)
        jax.block_until_ready(out)
        return out
    except Exception:
        if not _SINGLE_BUFFER_WEIGHTS:
            raise
        _SINGLE_BUFFER_WEIGHTS = False
        jax.clear_caches()
        out = fn(*args)
        jax.block_until_ready(out)
        return out


if __name__ == "__main__":
    key = jax.random.PRNGKey(0)
    k_param, k_x = jax.random.split(key)

    # Small shapes consistent with the module signature.
    B, S, data_dim = 2, 16, 4
    hidden_dim, num_blocks = 32, 2

    params = init_params(k_param, data_dim=data_dim, hidden_dim=hidden_dim,
                         num_blocks=num_blocks)

    # Simplex-valued input: each feature vector lies on the probability simplex.
    x = jax.nn.softmax(jax.random.normal(k_x, (B, S, data_dim)),
                       axis=-1).astype(jnp.float32)

    ref = _reference(params, x, learnable_skip=True)

    def check(streaming):
        fwd = jax.jit(functools.partial(simplex_residual_mlp, learnable_skip=True,
                                        weight_streaming=streaming))
        out = _run_with_fallback(fwd, params, x)
        assert out.shape == x.shape, out.shape
        assert bool(jnp.all(jnp.isfinite(out)))
        err = float(jnp.max(jnp.abs(out - ref)))
        assert bool(jnp.allclose(out, ref, atol=5e-3, rtol=5e-2)), (streaming, err)
        return out

    check(None)    # auto heuristic -> resident-weights path at this scale (v5e/v6e style)
    check(True)    # forced per-block weight streaming path (v7x / large-model fit)
    print("KERNEL_OK")
</pallas_src>

<mosaic_0001>
module attributes {stable_mosaic.version = 11 : i64} {
  func.func @_resident_kernel(%arg0: i32, %arg1: memref<2xf32, #tpu.memory_space<smem>>, %arg2: memref<16x128xbf16, #tpu.memory_space<vmem>>, %arg3: memref<128x128xbf16, #tpu.memory_space<vmem>>, %arg4: memref<1x128xf32, #tpu.memory_space<vmem>>, %arg5: memref<2x1x128xf32, #tpu.memory_space<vmem>>, %arg6: memref<2x1x128xf32, #tpu.memory_space<vmem>>, %arg7: memref<2x128x128xbf16, #tpu.memory_space<vmem>>, %arg8: memref<2x1x128xf32, #tpu.memory_space<vmem>>, %arg9: memref<2x128x128xbf16, #tpu.memory_space<vmem>>, %arg10: memref<2x1x128xf32, #tpu.memory_space<vmem>>, %arg11: memref<128x128xbf16, #tpu.memory_space<vmem>>, %arg12: memref<1x128xf32, #tpu.memory_space<vmem>>, %arg13: memref<16x128xf32, #tpu.memory_space<vmem>>) attributes {dimension_semantics = [#tpu.dimension_semantics<parallel>], iteration_bounds = array<i64: 2>, scalar_prefetch = 1 : i64, scratch_operands = 0 : i64, tpu.core_type = #tpu.core_type<tc>, window_params = [{transform_indices = @transform_0, window_bounds = array<i64: 16, 128>}, {pipeline_mode = #tpu.pipeline_mode<synchronous>, transform_indices = @transform_1, window_bounds = array<i64: 128, 128>}, {pipeline_mode = #tpu.pipeline_mode<synchronous>, transform_indices = @transform_2, window_bounds = array<i64: 1, 128>}, {pipeline_mode = #tpu.pipeline_mode<synchronous>, transform_indices = @transform_3, window_bounds = array<i64: 2, 1, 128>}, {pipeline_mode = #tpu.pipeline_mode<synchronous>, transform_indices = @transform_4, window_bounds = array<i64: 2, 1, 128>}, {pipeline_mode = #tpu.pipeline_mode<synchronous>, transform_indices = @transform_5, window_bounds = array<i64: 2, 128, 128>}, {pipeline_mode = #tpu.pipeline_mode<synchronous>, transform_indices = @transform_6, window_bounds = array<i64: 2, 1, 128>}, {pipeline_mode = #tpu.pipeline_mode<synchronous>, transform_indices = @transform_7, window_bounds = array<i64: 2, 128, 128>}, {pipeline_mode = #tpu.pipeline_mode<synchronous>, transform_indices = @transform_8, window_bounds = array<i64: 2, 1, 128>}, {pipeline_mode = #tpu.pipeline_mode<synchronous>, transform_indices = @transform_9, window_bounds = array<i64: 128, 128>}, {pipeline_mode = #tpu.pipeline_mode<synchronous>, transform_indices = @transform_10, window_bounds = array<i64: 1, 128>}, {transform_indices = @transform_11, window_bounds = array<i64: 16, 128>}]} {
    %c0 = arith.constant 0 : index
    %c0_0 = arith.constant 0 : index
    %0 = vector.load %arg2[%c0, %c0_0] : memref<16x128xbf16, #tpu.memory_space<vmem>>, vector<16x128xbf16>
    %c0_1 = arith.constant 0 : index
    %c0_2 = arith.constant 0 : index
    %1 = vector.load %arg3[%c0_1, %c0_2] : memref<128x128xbf16, #tpu.memory_space<vmem>>, vector<128x128xbf16>
    %cst = arith.constant dense<0.000000e+00> : vector<16x128xf32>
    %2 = tpu.matmul %0, %1, %cst {dimension_numbers = #tpu.dot_dimension_numbers<[1], [0], [0], [1], [0, 0, 1, 1], [], []>} : vector<16x128xbf16>, vector<128x128xbf16>, vector<16x128xf32> -> vector<16x128xf32>
    %c0_3 = arith.constant 0 : index
    %c0_4 = arith.constant 0 : index
    %3 = vector.load %arg4[%c0_3, %c0_4] : memref<1x128xf32, #tpu.memory_space<vmem>>, vector<1x128xf32>
    %4 = vector.broadcast %3 : vector<1x128xf32> to vector<16x128xf32>
    %5 = arith.addf %2, %4 : vector<16x128xf32>
    %6 = tpu.iota {dimensions = array<i32: 1>} : vector<1x128xi32>
    %c32_i32 = arith.constant 32 : i32
    %7 = vector.broadcast %c32_i32 : i32 to vector<1x128xi32>
    %8 = arith.cmpi slt, %6, %7 : vector<1x128xi32>
    %c0_i32 = arith.constant 0 : i32
    %c2_i32 = arith.constant 2 : i32
    %9 = arith.addi %c0_i32, %c2_i32 : i32
    %c1_i32 = arith.constant 1 : i32
    %10 = scf.for %arg14 = %c0_i32 to %9 step %c1_i32 iter_args(%arg15 = %5) -> (vector<16x128xf32>)  : i32 {
      %24 = arith.index_cast %arg14 : i32 to index
      %c0_15 = arith.constant 0 : index
      %c0_16 = arith.constant 0 : index
      %25 = vector.load %arg5[%24, %c0_15, %c0_16] : memref<2x1x128xf32, #tpu.memory_space<vmem>>, vector<1x1x128xf32>
      %26 = vector.shape_cast %25 : vector<1x1x128xf32> to vector<1x128xf32>
      %27 = arith.index_cast %arg14 : i32 to index
      %c0_17 = arith.constant 0 : index
      %c0_18 = arith.constant 0 : index
      %28 = vector.load %arg6[%27, %c0_17, %c0_18] : memref<2x1x128xf32, #tpu.memory_space<vmem>>, vector<1x1x128xf32>
      %29 = vector.shape_cast %28 : vector<1x1x128xf32> to vector<1x128xf32>
      %30 = arith.index_cast %arg14 : i32 to index
      %c0_19 = arith.constant 0 : index
      %c0_20 = arith.constant 0 : index
      %31 = vector.load %arg7[%30, %c0_19, %c0_20] : memref<2x128x128xbf16, #tpu.memory_space<vmem>>, vector<1x128x128xbf16>
      %32 = vector.shape_cast %31 : vector<1x128x128xbf16> to vector<128x128xbf16>
      %33 = arith.index_cast %arg14 : i32 to index
      %c0_21 = arith.constant 0 : index
      %c0_22 = arith.constant 0 : index
      %34 = vector.load %arg8[%33, %c0_21, %c0_22] : memref<2x1x128xf32, #tpu.memory_space<vmem>>, vector<1x1x128xf32>
      %35 = vector.shape_cast %34 : vector<1x1x128xf32> to vector<1x128xf32>
      %36 = arith.index_cast %arg14 : i32 to index
      %c0_23 = arith.constant 0 : index
      %c0_24 = arith.constant 0 : index
      %37 = vector.load %arg9[%36, %c0_23, %c0_24] : memref<2x128x128xbf16, #tpu.memory_space<vmem>>, vector<1x128x128xbf16>
      %38 = vector.shape_cast %37 : vector<1x128x128xbf16> to vector<128x128xbf16>
      %39 = arith.index_cast %arg14 : i32 to index
      %c0_25 = arith.constant 0 : index
      %c0_26 = arith.constant 0 : index
      %40 = vector.load %arg10[%39, %c0_25, %c0_26] : memref<2x1x128xf32, #tpu.memory_space<vmem>>, vector<1x1x128xf32>
      %41 = vector.shape_cast %40 : vector<1x1x128xf32> to vector<1x128xf32>
      %42 = arith.index_cast %arg14 : i32 to index
      %43 = memref.load %arg1[%42] : memref<2xf32, #tpu.memory_space<smem>>
      %cst_27 = arith.constant dense<0.000000e+00> : vector<16xf32>
      %44 = vector.multi_reduction <add>, %arg15, %cst_27 [1] : vector<16x128xf32> to vector<16xf32>
      %45 = vector.shape_cast %44 : vector<16xf32> to vector<16x1xf32>
      %cst_28 = arith.constant 3.125000e-02 : f32
      %46 = vector.broadcast %cst_28 : f32 to vector<16x1xf32>
      %47 = arith.mulf %45, %46 : vector<16x1xf32>
      %48 = vector.broadcast %47 : vector<16x1xf32> to vector<16x128xf32>
      %49 = arith.subf %arg15, %48 : vector<16x128xf32>
      %cst_29 = arith.constant 0.000000e+00 : f32
      %50 = vector.shape_cast %8 : vector<1x128xi1> to vector<1x128xi1>
      %51 = vector.broadcast %50 : vector<1x128xi1> to vector<16x128xi1>
      %52 = vector.broadcast %cst_29 : f32 to vector<16x128xf32>
      %53 = arith.select %51, %49, %52 : vector<16x128xi1>, vector<16x128xf32>
      %54 = arith.mulf %53, %53 : vector<16x128xf32>
      %cst_30 = arith.constant dense<0.000000e+00> : vector<16xf32>
      %55 = vector.multi_reduction <add>, %54, %cst_30 [1] : vector<16x128xf32> to vector<16xf32>
      %56 = vector.shape_cast %55 : vector<16xf32> to vector<16x1xf32>
      %cst_31 = arith.constant 3.125000e-02 : f32
      %57 = vector.broadcast %cst_31 : f32 to vector<16x1xf32>
      %58 = arith.mulf %56, %57 : vector<16x1xf32>
      %cst_32 = arith.constant 9.99999974E-6 : f32
      %59 = vector.broadcast %cst_32 : f32 to vector<16x1xf32>
      %60 = arith.addf %58, %59 : vector<16x1xf32>
      %61 = math.rsqrt %60 : vector<16x1xf32>
      %62 = vector.broadcast %61 : vector<16x1xf32> to vector<16x128xf32>
      %63 = arith.mulf %53, %62 : vector<16x128xf32>
      %64 = vector.broadcast %26 : vector<1x128xf32> to vector<16x128xf32>
      %65 = arith.mulf %63, %64 : vector<16x128xf32>
      %66 = vector.broadcast %29 : vector<1x128xf32> to vector<16x128xf32>
      %67 = arith.addf %65, %66 : vector<16x128xf32>
      %68 = arith.truncf %67 : vector<16x128xf32> to vector<16x128xbf16>
      %cst_33 = arith.constant dense<0.000000e+00> : vector<16x128xf32>
      %69 = tpu.matmul %68, %32, %cst_33 {dimension_numbers = #tpu.dot_dimension_numbers<[1], [0], [0], [1], [0, 0, 1, 1], [], []>} : vector<16x128xbf16>, vector<128x128xbf16>, vector<16x128xf32> -> vector<16x128xf32>
      %70 = vector.broadcast %35 : vector<1x128xf32> to vector<16x128xf32>
      %71 = arith.addf %69, %70 : vector<16x128xf32>
      %cst_34 = arith.constant 5.000000e-01 : f32
      %72 = vector.broadcast %cst_34 : f32 to vector<16x128xf32>
      %73 = arith.mulf %72, %71 : vector<16x128xf32>
      %cst_35 = arith.constant 4.471500e-02 : f32
      %74 = vector.broadcast %cst_35 : f32 to vector<16x128xf32>
      %75 = arith.mulf %74, %71 : vector<16x128xf32>
      %76 = arith.mulf %75, %71 : vector<16x128xf32>
      %77 = arith.mulf %76, %71 : vector<16x128xf32>
      %78 = arith.addf %71, %77 : vector<16x128xf32>
      %cst_36 = arith.constant 0.797884583 : f32
      %79 = vector.broadcast %cst_36 : f32 to vector<16x128xf32>
      %80 = arith.mulf %79, %78 : vector<16x128xf32>
      %81 = math.tanh %80 : vector<16x128xf32>
      %cst_37 = arith.constant 1.000000e+00 : f32
      %82 = vector.broadcast %cst_37 : f32 to vector<16x128xf32>
      %83 = arith.addf %82, %81 : vector<16x128xf32>
      %84 = arith.mulf %73, %83 : vector<16x128xf32>
      %85 = arith.truncf %84 : vector<16x128xf32> to vector<16x128xbf16>
      %cst_38 = arith.constant dense<0.000000e+00> : vector<16x128xf32>
      %86 = tpu.matmul %85, %38, %cst_38 {dimension_numbers = #tpu.dot_dimension_numbers<[1], [0], [0], [1], [0, 0, 1, 1], [], []>} : vector<16x128xbf16>, vector<128x128xbf16>, vector<16x128xf32> -> vector<16x128xf32>
      %87 = vector.broadcast %41 : vector<1x128xf32> to vector<16x128xf32>
      %88 = arith.addf %86, %87 : vector<16x128xf32>
      %89 = vector.broadcast %43 : f32 to vector<16x128xf32>
      %90 = arith.mulf %89, %arg15 : vector<16x128xf32>
      %91 = arith.addf %90, %88 : vector<16x128xf32>
      scf.yield %91 : vector<16x128xf32>
    }
    %c2_i32_5 = arith.constant 2 : i32
    %11 = arith.truncf %10 : vector<16x128xf32> to vector<16x128xbf16>
    %c0_6 = arith.constant 0 : index
    %c0_7 = arith.constant 0 : index
    %12 = vector.load %arg11[%c0_6, %c0_7] : memref<128x128xbf16, #tpu.memory_space<vmem>>, vector<128x128xbf16>
    %cst_8 = arith.constant dense<0.000000e+00> : vector<16x128xf32>
    %13 = tpu.matmul %11, %12, %cst_8 {dimension_numbers = #tpu.dot_dimension_numbers<[1], [0], [0], [1], [0, 0, 1, 1], [], []>} : vector<16x128xbf16>, vector<128x128xbf16>, vector<16x128xf32> -> vector<16x128xf32>
    %c0_9 = arith.constant 0 : index
    %c0_10 = arith.constant 0 : index
    %14 = vector.load %arg12[%c0_9, %c0_10] : memref<1x128xf32, #tpu.memory_space<vmem>>, vector<1x128xf32>
    %15 = vector.broadcast %14 : vector<1x128xf32> to vector<16x128xf32>
    %16 = arith.addf %13, %15 : vector<16x128xf32>
    %cst_11 = arith.constant dense<0.000000e+00> : vector<16xf32>
    %17 = vector.multi_reduction <add>, %16, %cst_11 [1] : vector<16x128xf32> to vector<16xf32>
    %18 = vector.shape_cast %17 : vector<16xf32> to vector<16x1xf32>
    %cst_12 = arith.constant 2.500000e-01 : f32
    %19 = vector.broadcast %cst_12 : f32 to vector<16x1xf32>
    %20 = arith.mulf %18, %19 : vector<16x1xf32>
    %21 = vector.broadcast %20 : vector<16x1xf32> to vector<16x128xf32>
    %22 = arith.subf %16, %21 : vector<16x128xf32>
    %c0_13 = arith.constant 0 : index
    %c0_14 = arith.constant 0 : index
    %23 = vector.load %arg13[%c0_13, %c0_14] : memref<16x128xf32, #tpu.memory_space<vmem>>, vector<16x128xf32>
    tpu.vector_store %arg13[%c0_13, %c0_14], %22 {strides = array<i32>} : memref<16x128xf32, #tpu.memory_space<vmem>>, vector<16x128xf32>,
    return
  }
  func.func @transform_0(%arg0: i32, %arg1: memref<2xf32, #tpu.memory_space<smem>>) -> (i32, i32) {
    %c0_i32 = arith.constant 0 : i32
    %c0_i32_0 = arith.constant 0 : i32
    return %arg0, %c0_i32 : i32, i32
  }
  func.func @transform_1(%arg0: i32, %arg1: memref<2xf32, #tpu.memory_space<smem>>) -> (i32, i32) {
    %c0_i32 = arith.constant 0 : i32
    %c0_i32_0 = arith.constant 0 : i32
    %c0_i32_1 = arith.constant 0 : i32
    return %c0_i32, %c0_i32_0 : i32, i32
  }
  func.func @transform_2(%arg0: i32, %arg1: memref<2xf32, #tpu.memory_space<smem>>) -> (i32, i32) {
    %c0_i32 = arith.constant 0 : i32
    %c0_i32_0 = arith.constant 0 : i32
    %c0_i32_1 = arith.constant 0 : i32
    return %c0_i32, %c0_i32_0 : i32, i32
  }
  func.func @transform_3(%arg0: i32, %arg1: memref<2xf32, #tpu.memory_space<smem>>) -> (i32, i32, i32) {
    %c0_i32 = arith.constant 0 : i32
    %c0_i32_0 = arith.constant 0 : i32
    %c0_i32_1 = arith.constant 0 : i32
    %c0_i32_2 = arith.constant 0 : i32
    return %c0_i32, %c0_i32_0, %c0_i32_1 : i32, i32, i32
  }
  func.func @transform_4(%arg0: i32, %arg1: memref<2xf32, #tpu.memory_space<smem>>) -> (i32, i32, i32) {
    %c0_i32 = arith.constant 0 : i32
    %c0_i32_0 = arith.constant 0 : i32
    %c0_i32_1 = arith.constant 0 : i32
    %c0_i32_2 = arith.constant 0 : i32
    return %c0_i32, %c0_i32_0, %c0_i32_1 : i32, i32, i32
  }
  func.func @transform_5(%arg0: i32, %arg1: memref<2xf32, #tpu.memory_space<smem>>) -> (i32, i32, i32) {
    %c0_i32 = arith.constant 0 : i32
    %c0_i32_0 = arith.constant 0 : i32
    %c0_i32_1 = arith.constant 0 : i32
    %c0_i32_2 = arith.constant 0 : i32
    return %c0_i32, %c0_i32_0, %c0_i32_1 : i32, i32, i32
  }
  func.func @transform_6(%arg0: i32, %arg1: memref<2xf32, #tpu.memory_space<smem>>) -> (i32, i32, i32) {
    %c0_i32 = arith.constant 0 : i32
    %c0_i32_0 = arith.constant 0 : i32
    %c0_i32_1 = arith.constant 0 : i32
    %c0_i32_2 = arith.constant 0 : i32
    return %c0_i32, %c0_i32_0, %c0_i32_1 : i32, i32, i32
  }
  func.func @transform_7(%arg0: i32, %arg1: memref<2xf32, #tpu.memory_space<smem>>) -> (i32, i32, i32) {
    %c0_i32 = arith.constant 0 : i32
    %c0_i32_0 = arith.constant 0 : i32
    %c0_i32_1 = arith.constant 0 : i32
    %c0_i32_2 = arith.constant 0 : i32
    return %c0_i32, %c0_i32_0, %c0_i32_1 : i32, i32, i32
  }
  func.func @transform_8(%arg0: i32, %arg1: memref<2xf32, #tpu.memory_space<smem>>) -> (i32, i32, i32) {
    %c0_i32 = arith.constant 0 : i32
    %c0_i32_0 = arith.constant 0 : i32
    %c0_i32_1 = arith.constant 0 : i32
    %c0_i32_2 = arith.constant 0 : i32
    return %c0_i32, %c0_i32_0, %c0_i32_1 : i32, i32, i32
  }
  func.func @transform_9(%arg0: i32, %arg1: memref<2xf32, #tpu.memory_space<smem>>) -> (i32, i32) {
    %c0_i32 = arith.constant 0 : i32
    %c0_i32_0 = arith.constant 0 : i32
    %c0_i32_1 = arith.constant 0 : i32
    return %c0_i32, %c0_i32_0 : i32, i32
  }
  func.func @transform_10(%arg0: i32, %arg1: memref<2xf32, #tpu.memory_space<smem>>) -> (i32, i32) {
    %c0_i32 = arith.constant 0 : i32
    %c0_i32_0 = arith.constant 0 : i32
    %c0_i32_1 = arith.constant 0 : i32
    return %c0_i32, %c0_i32_0 : i32, i32
  }
  func.func @transform_11(%arg0: i32, %arg1: memref<2xf32, #tpu.memory_space<smem>>) -> (i32, i32) {
    %c0_i32 = arith.constant 0 : i32
    %c0_i32_0 = arith.constant 0 : i32
    return %arg0, %c0_i32 : i32, i32
  }
}

module attributes {stable_mosaic.version = 11 : i64} {
  func.func @_resident_kernel(%arg0: i32, %arg1: memref<2xf32, #tpu.memory_space<smem>>, %arg2: memref<16x128xbf16, #tpu.memory_space<vmem>>, %arg3: memref<128x128xbf16, #tpu.memory_space<vmem>>, %arg4: memref<1x128xf32, #tpu.memory_space<vmem>>, %arg5: memref<2x1x128xf32, #tpu.memory_space<vmem>>, %arg6: memref<2x1x128xf32, #tpu.memory_space<vmem>>, %arg7: memref<2x128x128xbf16, #tpu.memory_space<vmem>>, %arg8: memref<2x1x128xf32, #tpu.memory_space<vmem>>, %arg9: memref<2x128x128xbf16, #tpu.memory_space<vmem>>, %arg10: memref<2x1x128xf32, #tpu.memory_space<vmem>>, %arg11: memref<128x128xbf16, #tpu.memory_space<vmem>>, %arg12: memref<1x128xf32, #tpu.memory_space<vmem>>, %arg13: memref<16x128xf32, #tpu.memory_space<vmem>>) attributes {dimension_semantics = [#tpu.dimension_semantics<parallel>], iteration_bounds = array<i64: 2>, scalar_prefetch = 1 : i64, scratch_operands = 0 : i64, tpu.core_type = #tpu.core_type<tc>, window_params = [{transform_indices = @transform_0, window_bounds = array<i64: 16, 128>}, {pipeline_mode = #tpu.pipeline_mode<synchronous>, transform_indices = @transform_1, window_bounds = array<i64: 128, 128>}, {pipeline_mode = #tpu.pipeline_mode<synchronous>, transform_indices = @transform_2, window_bounds = array<i64: 1, 128>}, {pipeline_mode = #tpu.pipeline_mode<synchronous>, transform_indices = @transform_3, window_bounds = array<i64: 2, 1, 128>}, {pipeline_mode = #tpu.pipeline_mode<synchronous>, transform_indices = @transform_4, window_bounds = array<i64: 2, 1, 128>}, {pipeline_mode = #tpu.pipeline_mode<synchronous>, transform_indices = @transform_5, window_bounds = array<i64: 2, 128, 128>}, {pipeline_mode = #tpu.pipeline_mode<synchronous>, transform_indices = @transform_6, window_bounds = array<i64: 2, 1, 128>}, {pipeline_mode = #tpu.pipeline_mode<synchronous>, transform_indices = @transform_7, window_bounds = array<i64: 2, 128, 128>}, {pipeline_mode = #tpu.pipeline_mode<synchronous>, transform_indices = @transform_8, window_bounds = array<i64: 2, 1, 128>}, {pipeline_mode = #tpu.pipeline_mode<synchronous>, transform_indices = @transform_9, window_bounds = array<i64: 128, 128>}, {pipeline_mode = #tpu.pipeline_mode<synchronous>, transform_indices = @transform_10, window_bounds = array<i64: 1, 128>}, {transform_indices = @transform_11, window_bounds = array<i64: 16, 128>}]} {
    %c0 = arith.constant 0 : index
    %c0_0 = arith.constant 0 : index
    %0 = vector.load %arg2[%c0, %c0_0] : memref<16x128xbf16, #tpu.memory_space<vmem>>, vector<16x128xbf16>
    %c0_1 = arith.constant 0 : index
    %c0_2 = arith.constant 0 : index
    %1 = vector.load %arg3[%c0_1, %c0_2] : memref<128x128xbf16, #tpu.memory_space<vmem>>, vector<128x128xbf16>
    %cst = arith.constant dense<0.000000e+00> : vector<16x128xf32>
    %2 = tpu.matmul %0, %1, %cst {dimension_numbers = #tpu.dot_dimension_numbers<[1], [0], [0], [1], [0, 0, 1, 1], [], []>} : vector<16x128xbf16>, vector<128x128xbf16>, vector<16x128xf32> -> vector<16x128xf32>
    %c0_3 = arith.constant 0 : index
    %c0_4 = arith.constant 0 : index
    %3 = vector.load %arg4[%c0_3, %c0_4] : memref<1x128xf32, #tpu.memory_space<vmem>>, vector<1x128xf32>
    %4 = vector.broadcast %3 : vector<1x128xf32> to vector<16x128xf32>
    %5 = arith.addf %2, %4 : vector<16x128xf32>
    %6 = tpu.iota {dimensions = array<i32: 1>} : vector<1x128xi32>
    %c32_i32 = arith.constant 32 : i32
    %7 = vector.broadcast %c32_i32 : i32 to vector<1x128xi32>
    %8 = arith.cmpi slt, %6, %7 : vector<1x128xi32>
    %c0_i32 = arith.constant 0 : i32
    %c2_i32 = arith.constant 2 : i32
    %9 = arith.addi %c0_i32, %c2_i32 : i32
    %c1_i32 = arith.constant 1 : i32
    %10 = scf.for %arg14 = %c0_i32 to %9 step %c1_i32 iter_args(%arg15 = %5) -> (vector<16x128xf32>)  : i32 {
      %24 = arith.index_cast %arg14 : i32 to index
      %c0_15 = arith.constant 0 : index
      %c0_16 = arith.constant 0 : index
      %25 = vector.load %arg5[%24, %c0_15, %c0_16] : memref<2x1x128xf32, #tpu.memory_space<vmem>>, vector<1x1x128xf32>
      %26 = vector.shape_cast %25 : vector<1x1x128xf32> to vector<1x128xf32>
      %27 = arith.index_cast %arg14 : i32 to index
      %c0_17 = arith.constant 0 : index
      %c0_18 = arith.constant 0 : index
      %28 = vector.load %arg6[%27, %c0_17, %c0_18] : memref<2x1x128xf32, #tpu.memory_space<vmem>>, vector<1x1x128xf32>
      %29 = vector.shape_cast %28 : vector<1x1x128xf32> to vector<1x128xf32>
      %30 = arith.index_cast %arg14 : i32 to index
      %c0_19 = arith.constant 0 : index
      %c0_20 = arith.constant 0 : index
      %31 = vector.load %arg7[%30, %c0_19, %c0_20] : memref<2x128x128xbf16, #tpu.memory_space<vmem>>, vector<1x128x128xbf16>
      %32 = vector.shape_cast %31 : vector<1x128x128xbf16> to vector<128x128xbf16>
      %33 = arith.index_cast %arg14 : i32 to index
      %c0_21 = arith.constant 0 : index
      %c0_22 = arith.constant 0 : index
      %34 = vector.load %arg8[%33, %c0_21, %c0_22] : memref<2x1x128xf32, #tpu.memory_space<vmem>>, vector<1x1x128xf32>
      %35 = vector.shape_cast %34 : vector<1x1x128xf32> to vector<1x128xf32>
      %36 = arith.index_cast %arg14 : i32 to index
      %c0_23 = arith.constant 0 : index
      %c0_24 = arith.constant 0 : index
      %37 = vector.load %arg9[%36, %c0_23, %c0_24] : memref<2x128x128xbf16, #tpu.memory_space<vmem>>, vector<1x128x128xbf16>
      %38 = vector.shape_cast %37 : vector<1x128x128xbf16> to vector<128x128xbf16>
      %39 = arith.index_cast %arg14 : i32 to index
      %c0_25 = arith.constant 0 : index
      %c0_26 = arith.constant 0 : index
      %40 = vector.load %arg10[%39, %c0_25, %c0_26] : memref<2x1x128xf32, #tpu.memory_space<vmem>>, vector<1x1x128xf32>
      %41 = vector.shape_cast %40 : vector<1x1x128xf32> to vector<1x128xf32>
      %42 = arith.index_cast %arg14 : i32 to index
      %43 = memref.load %arg1[%42] : memref<2xf32, #tpu.memory_space<smem>>
      %cst_27 = arith.constant dense<0.000000e+00> : vector<16xf32>
      %44 = vector.multi_reduction <add>, %arg15, %cst_27 [1] : vector<16x128xf32> to vector<16xf32>
      %45 = vector.shape_cast %44 : vector<16xf32> to vector<16x1xf32>
      %cst_28 = arith.constant 3.125000e-02 : f32
      %46 = vector.broadcast %cst_28 : f32 to vector<16x1xf32>
      %47 = arith.mulf %45, %46 : vector<16x1xf32>
      %48 = vector.broadcast %47 : vector<16x1xf32> to vector<16x128xf32>
      %49 = arith.subf %arg15, %48 : vector<16x128xf32>
      %cst_29 = arith.constant 0.000000e+00 : f32
      %50 = vector.shape_cast %8 : vector<1x128xi1> to vector<1x128xi1>
      %51 = vector.broadcast %50 : vector<1x128xi1> to vector<16x128xi1>
      %52 = vector.broadcast %cst_29 : f32 to vector<16x128xf32>
      %53 = arith.select %51, %49, %52 : vector<16x128xi1>, vector<16x128xf32>
      %54 = arith.mulf %53, %53 : vector<16x128xf32>
      %cst_30 = arith.constant dense<0.000000e+00> : vector<16xf32>
      %55 = vector.multi_reduction <add>, %54, %cst_30 [1] : vector<16x128xf32> to vector<16xf32>
      %56 = vector.shape_cast %55 : vector<16xf32> to vector<16x1xf32>
      %cst_31 = arith.constant 3.125000e-02 : f32
      %57 = vector.broadcast %cst_31 : f32 to vector<16x1xf32>
      %58 = arith.mulf %56, %57 : vector<16x1xf32>
      %cst_32 = arith.constant 9.99999974E-6 : f32
      %59 = vector.broadcast %cst_32 : f32 to vector<16x1xf32>
      %60 = arith.addf %58, %59 : vector<16x1xf32>
      %61 = math.rsqrt %60 : vector<16x1xf32>
      %62 = vector.broadcast %61 : vector<16x1xf32> to vector<16x128xf32>
      %63 = arith.mulf %53, %62 : vector<16x128xf32>
      %64 = vector.broadcast %26 : vector<1x128xf32> to vector<16x128xf32>
      %65 = arith.mulf %63, %64 : vector<16x128xf32>
      %66 = vector.broadcast %29 : vector<1x128xf32> to vector<16x128xf32>
      %67 = arith.addf %65, %66 : vector<16x128xf32>
      %68 = arith.truncf %67 : vector<16x128xf32> to vector<16x128xbf16>
      %cst_33 = arith.constant dense<0.000000e+00> : vector<16x128xf32>
      %69 = tpu.matmul %68, %32, %cst_33 {dimension_numbers = #tpu.dot_dimension_numbers<[1], [0], [0], [1], [0, 0, 1, 1], [], []>} : vector<16x128xbf16>, vector<128x128xbf16>, vector<16x128xf32> -> vector<16x128xf32>
      %70 = vector.broadcast %35 : vector<1x128xf32> to vector<16x128xf32>
      %71 = arith.addf %69, %70 : vector<16x128xf32>
      %cst_34 = arith.constant 5.000000e-01 : f32
      %72 = vector.broadcast %cst_34 : f32 to vector<16x128xf32>
      %73 = arith.mulf %72, %71 : vector<16x128xf32>
      %cst_35 = arith.constant 4.471500e-02 : f32
      %74 = vector.broadcast %cst_35 : f32 to vector<16x128xf32>
      %75 = arith.mulf %74, %71 : vector<16x128xf32>
      %76 = arith.mulf %75, %71 : vector<16x128xf32>
      %77 = arith.mulf %76, %71 : vector<16x128xf32>
      %78 = arith.addf %71, %77 : vector<16x128xf32>
      %cst_36 = arith.constant 0.797884583 : f32
      %79 = vector.broadcast %cst_36 : f32 to vector<16x128xf32>
      %80 = arith.mulf %79, %78 : vector<16x128xf32>
      %81 = math.tanh %80 : vector<16x128xf32>
      %cst_37 = arith.constant 1.000000e+00 : f32
      %82 = vector.broadcast %cst_37 : f32 to vector<16x128xf32>
      %83 = arith.addf %82, %81 : vector<16x128xf32>
      %84 = arith.mulf %73, %83 : vector<16x128xf32>
      %85 = arith.truncf %84 : vector<16x128xf32> to vector<16x128xbf16>
      %cst_38 = arith.constant dense<0.000000e+00> : vector<16x128xf32>
      %86 = tpu.matmul %85, %38, %cst_38 {dimension_numbers = #tpu.dot_dimension_numbers<[1], [0], [0], [1], [0, 0, 1, 1], [], []>} : vector<16x128xbf16>, vector<128x128xbf16>, vector<16x128xf32> -> vector<16x128xf32>
      %87 = vector.broadcast %41 : vector<1x128xf32> to vector<16x128xf32>
      %88 = arith.addf %86, %87 : vector<16x128xf32>
      %89 = vector.broadcast %43 : f32 to vector<16x128xf32>
      %90 = arith.mulf %89, %arg15 : vector<16x128xf32>
      %91 = arith.addf %90, %88 : vector<16x128xf32>
      scf.yield %91 : vector<16x128xf32>
    }
    %c2_i32_5 = arith.constant 2 : i32
    %11 = arith.truncf %10 : vector<16x128xf32> to vector<16x128xbf16>
    %c0_6 = arith.constant 0 : index
    %c0_7 = arith.constant 0 : index
    %12 = vector.load %arg11[%c0_6, %c0_7] : memref<128x128xbf16, #tpu.memory_space<vmem>>, vector<128x128xbf16>
    %cst_8 = arith.constant dense<0.000000e+00> : vector<16x128xf32>
    %13 = tpu.matmul %11, %12, %cst_8 {dimension_numbers = #tpu.dot_dimension_numbers<[1], [0], [0], [1], [0, 0, 1, 1], [], []>} : vector<16x128xbf16>, vector<128x128xbf16>, vector<16x128xf32> -> vector<16x128xf32>
    %c0_9 = arith.constant 0 : index
    %c0_10 = arith.constant 0 : index
    %14 = vector.load %arg12[%c0_9, %c0_10] : memref<1x128xf32, #tpu.memory_space<vmem>>, vector<1x128xf32>
    %15 = vector.broadcast %14 : vector<1x128xf32> to vector<16x128xf32>
    %16 = arith.addf %13, %15 : vector<16x128xf32>
    %cst_11 = arith.constant dense<0.000000e+00> : vector<16xf32>
    %17 = vector.multi_reduction <add>, %16, %cst_11 [1] : vector<16x128xf32> to vector<16xf32>
    %18 = vector.shape_cast %17 : vector<16xf32> to vector<16x1xf32>
    %cst_12 = arith.constant 2.500000e-01 : f32
    %19 = vector.broadcast %cst_12 : f32 to vector<16x1xf32>
    %20 = arith.mulf %18, %19 : vector<16x1xf32>
    %21 = vector.broadcast %20 : vector<16x1xf32> to vector<16x128xf32>
    %22 = arith.subf %16, %21 : vector<16x128xf32>
    %c0_13 = arith.constant 0 : index
    %c0_14 = arith.constant 0 : index
    %23 = vector.load %arg13[%c0_13, %c0_14] : memref<16x128xf32, #tpu.memory_space<vmem>>, vector<16x128xf32>
    tpu.vector_store %arg13[%c0_13, %c0_14], %22 {strides = array<i32>} : memref<16x128xf32, #tpu.memory_space<vmem>>, vector<16x128xf32>,
    return
  }
  func.func @transform_0(%arg0: i32, %arg1: memref<2xf32, #tpu.memory_space<smem>>) -> (i32, i32) {
    %c0_i32 = arith.constant 0 : i32
    %c0_i32_0 = arith.constant 0 : i32
    return %arg0, %c0_i32 : i32, i32
  }
  func.func @transform_1(%arg0: i32, %arg1: memref<2xf32, #tpu.memory_space<smem>>) -> (i32, i32) {
    %c0_i32 = arith.constant 0 : i32
    %c0_i32_0 = arith.constant 0 : i32
    %c0_i32_1 = arith.constant 0 : i32
    return %c0_i32, %c0_i32_0 : i32, i32
  }
  func.func @transform_2(%arg0: i32, %arg1: memref<2xf32, #tpu.memory_space<smem>>) -> (i32, i32) {
    %c0_i32 = arith.constant 0 : i32
    %c0_i32_0 = arith.constant 0 : i32
    %c0_i32_1 = arith.constant 0 : i32
    return %c0_i32, %c0_i32_0 : i32, i32
  }
  func.func @transform_3(%arg0: i32, %arg1: memref<2xf32, #tpu.memory_space<smem>>) -> (i32, i32, i32) {
    %c0_i32 = arith.constant 0 : i32
    %c0_i32_0 = arith.constant 0 : i32
    %c0_i32_1 = arith.constant 0 : i32
    %c0_i32_2 = arith.constant 0 : i32
    return %c0_i32, %c0_i32_0, %c0_i32_1 : i32, i32, i32
  }
  func.func @transform_4(%arg0: i32, %arg1: memref<2xf32, #tpu.memory_space<smem>>) -> (i32, i32, i32) {
    %c0_i32 = arith.constant 0 : i32
    %c0_i32_0 = arith.constant 0 : i32
    %c0_i32_1 = arith.constant 0 : i32
    %c0_i32_2 = arith.constant 0 : i32
    return %c0_i32, %c0_i32_0, %c0_i32_1 : i32, i32, i32
  }
  func.func @transform_5(%arg0: i32, %arg1: memref<2xf32, #tpu.memory_space<smem>>) -> (i32, i32, i32) {
    %c0_i32 = arith.constant 0 : i32
    %c0_i32_0 = arith.constant 0 : i32
    %c0_i32_1 = arith.constant 0 : i32
    %c0_i32_2 = arith.constant 0 : i32
    return %c0_i32, %c0_i32_0, %c0_i32_1 : i32, i32, i32
  }
  func.func @transform_6(%arg0: i32, %arg1: memref<2xf32, #tpu.memory_space<smem>>) -> (i32, i32, i32) {
    %c0_i32 = arith.constant 0 : i32
    %c0_i32_0 = arith.constant 0 : i32
    %c0_i32_1 = arith.constant 0 : i32
    %c0_i32_2 = arith.constant 0 : i32
    return %c0_i32, %c0_i32_0, %c0_i32_1 : i32, i32, i32
  }
  func.func @transform_7(%arg0: i32, %arg1: memref<2xf32, #tpu.memory_space<smem>>) -> (i32, i32, i32) {
    %c0_i32 = arith.constant 0 : i32
    %c0_i32_0 = arith.constant 0 : i32
    %c0_i32_1 = arith.constant 0 : i32
    %c0_i32_2 = arith.constant 0 : i32
    return %c0_i32, %c0_i32_0, %c0_i32_1 : i32, i32, i32
  }
  func.func @transform_8(%arg0: i32, %arg1: memref<2xf32, #tpu.memory_space<smem>>) -> (i32, i32, i32) {
    %c0_i32 = arith.constant 0 : i32
    %c0_i32_0 = arith.constant 0 : i32
    %c0_i32_1 = arith.constant 0 : i32
    %c0_i32_2 = arith.constant 0 : i32
    return %c0_i32, %c0_i32_0, %c0_i32_1 : i32, i32, i32
  }
  func.func @transform_9(%arg0: i32, %arg1: memref<2xf32, #tpu.memory_space<smem>>) -> (i32, i32) {
    %c0_i32 = arith.constant 0 : i32
    %c0_i32_0 = arith.constant 0 : i32
    %c0_i32_1 = arith.constant 0 : i32
    return %c0_i32, %c0_i32_0 : i32, i32
  }
  func.func @transform_10(%arg0: i32, %arg1: memref<2xf32, #tpu.memory_space<smem>>) -> (i32, i32) {
    %c0_i32 = arith.constant 0 : i32
    %c0_i32_0 = arith.constant 0 : i32
    %c0_i32_1 = arith.constant 0 : i32
    return %c0_i32, %c0_i32_0 : i32, i32
  }
  func.func @transform_11(%arg0: i32, %arg1: memref<2xf32, #tpu.memory_space<smem>>) -> (i32, i32) {
    %c0_i32 = arith.constant 0 : i32
    %c0_i32_0 = arith.constant 0 : i32
    return %arg0, %c0_i32 : i32, i32
  }
}

</mosaic_0001>

<bundles_post_ra>
// kernel: simplex_residual_mlp.1
= control target key start
LH: loop header
LB: loop body
LE: loop exit
PB: predicated region body
PF: predicated region fallthrough
CT: control target
= control target key end

     0   :  { %s1590_s0 = inlined_call_operand.vmem [shape: f32[2], index: 0, kind: input, shape index: {}]   ;;  %s1591_s1 = inlined_call_operand.vmem [shape: bf16[32,128], index: 1, kind: input, shape index: {}]   ;;  %s1592_s2 = inlined_call_operand.vmem [shape: bf16[128,128], index: 2, kind: input, shape index: {}]   ;;  %s1593_s3 = inlined_call_operand.vmem [shape: f32[1,128], index: 3, kind: input, shape index: {}]   ;;  %s1594_s4 = inlined_call_operand.vmem [shape: f32[2,1,128], index: 4, kind: input, shape index: {}]   ;;  %s1595_s5 = inlined_call_operand.vmem [shape: f32[2,1,128], index: 5, kind: input, shape index: {}]   ;;  %s1596_s6 = inlined_call_operand.vmem [shape: bf16[2,128,128], index: 6, kind: input, shape index: {}]   ;;  %s1597_s7 = inlined_call_operand.vmem [shape: f32[2,1,128], index: 7, kind: input, shape index: {}]   ;;  %s1598_s8 = inlined_call_operand.vmem [shape: bf16[2,128,128], index: 8, kind: input, shape index: {}]   ;;  %s1599_s9 = inlined_call_operand.vmem [shape: f32[2,1,128], index: 9, kind: input, shape index: {}]   ;;  %s1600_s10 = inlined_call_operand.vmem [shape: bf16[128,128], index: 10, kind: input, shape index: {}]   ;;  %s1601_s11 = inlined_call_operand.vmem [shape: f32[1,128], index: 11, kind: input, shape index: {}]   ;;  %s1602_s12 = inlined_call_operand.vmem [shape: f32[32,128], index: 12, kind: output, shape index: {}]  }
   0x1   :  { %s17_s23 = sshll.u32 %s1590_s0, 4  ;;  %s18_s23 = int_to_ptr.vmem [resolvable:$true] %s17_s23 }
   0x2   :  { %s1279_s24 = scalar_lea.vmem %s18_s23, 16  ;;  %p1284_p1 = scmp.lt.s32.totalorder %s18_s23, %s18_s23 }
   0x3   :  { %p1280_p0 = scmp.ne.s32.totalorder %s18_s23, %s1279_s24  ;;  %p1285_p2 = scmp.lt.s32.totalorder %s1279_s24, %s1279_s24 }
   0x5   :  { %p1286_p3 = por %p1285_p2, %p1284_p1 }
   0x7   :  { %p1287_p4 = pnand %p1286_p3, %p1280_p0 }
   0x9   :  { %1290 = shalt.err (!%p1287_p4)  }
   0xa   :  { %s1325_s25 = smov [#allocation3]  }
   0xb   :  { %20 = dma.vmem_to_smem %s18_s23, 16, %s1325_s25, [#allocation2] }
   0xc   :  { %1307 = dma.done.wait [#allocation2], 16 }
   0xd   :  { %1308 = vsyncadd [#allocation2], 4294967280 }
   0xe   :  { %22 = sfence }
   0xf   :  { %s1398_s26 = smov 0  }
  0x10 LB: > { %s1030_s0 = sadd.s32 4294967295, %s1311_s26   ;;  %p1034_p5 = scmp.ge.s32.totalorder %s1311_s26, 1  ;;  %s1311_s26 = sphi %s1398_s26, %s28_s26  }
  0x11   : > { %p345_p6 = scmp.lt.s32.totalorder %s1311_s26, 3 }
  0x13   : > { %p346_p7 = pnand %p1034_p5, %p345_p6 }
  0x14   : > { %v1238_v0 = vld [vmem:[%s1592_s2] sm:$0xff] (!%p346_p7)   ;;  %v1326_v1 = vmov (!%p346_p7), 0.0   ;;  %v1239_v2 = vld [vmem:[%s1592_s2 + $0x8] sm:$0xff] (!%p346_p7)   ;;  %vm1327_vm0 = vmmov (!%p346_p7), 0   ;;  %s1035_s13 = sshll.u32 (!%p346_p7), %s1030_s0, 1  ;;  %v1240_v3 = vld [vmem:[%s1592_s2 + $0x10] sm:$0xff] (!%p346_p7)   ;;  %v518_v10 = vlaneseq (!%p346_p7) }
  0x15   : > { %349 = sbr.rel (%p346_p7) target bundleno = 1443 (0x5a3), region = 64  ;;  %1121 = vmatprep.subr.bf16.mxu0 (!%p346_p7), %v1326_v1  ;;  %1137 = vmatprep.mubr.msk.bf16.mxu0 (!%p346_p7), %vm1327_vm0, %v1326_v1  ;;  %p386_p8 = scmp.lt.s32.totalorder (!%p346_p7), %s1035_s13, 3  ;;  %v1241_v4 = vld [vmem:[%s1592_s2 + $0x18] sm:$0xff] (!%p346_p7)   ;;  %v1242_v5 = vld [vmem:[%s1592_s2 + $0x20] sm:$0xff] (!%p346_p7)   ;;  %v1243_v6 = vld [vmem:[%s1592_s2 + $0x28] sm:$0xff] (!%p346_p7)  }
  0x16   : > { %1122 = vmatpush3.bf16.msra.mxu0 (!%p346_p7), %v1238_v0  ;;  %v1244_v7 = vld [vmem:[%s1592_s2 + $0x30] sm:$0xff] (!%p346_p7)   ;;  %v1245_v8 = vld [vmem:[%s1592_s2 + $0x38] sm:$0xff] (!%p346_p7)   ;;  %v1448_v11 = vand.u32 (!%p346_p7), 127, %v518_v10  ;;  %v1039_v12 = vld [vmem:[%s1593_s3] ss:$0 sm:$0xff] (!%p346_p7)  ;;  %s1458_s18 = smov (!%p346_p7), 0  }
  0x17   : > { %1123 = vmatprep.subr.bf16.mxu0 (!%p346_p7), %v1326_v1 }
  0x18   : > { %vm520_vm1 = vcmp.lt.s32.totalorder (!%p346_p7), %v1448_v11, 32 }
  0x1a   : > { %1124 = vmatpush3.bf16.msra.mxu0 (!%p346_p7), %v1239_v2 }
  0x1b   : > { %1125 = vmatprep.subr.bf16.mxu0 (!%p346_p7), %v1326_v1 }
  0x1c   : > { %s1606_s13 = smov (!%p386_p8, %s1035_s13), 3 }
  0x1d   : > { %s1036_s16 = sshll.u32 %s1606_s13, 2  ;;  %s1038_s20 = sshll.u32 %s1606_s13, 3 }
  0x1e   : > { %s389_s19 = scalar_lea.vmem %s1591_s1, %s1036_s16  ;;  %s1426_s23 = scalar_lea.vmem %s1602_s12, %s1038_s20  ;;  %1126 = vmatpush3.bf16.msra.mxu0 %v1240_v3 }
  0x1f   : > { %1127 = vmatprep.subr.bf16.mxu0 %v1326_v1  ;;  %v1246_v9 = vld [vmem:[%s389_s19] sm:$0xff]  }
  0x22   : > { %1128 = vmatpush3.bf16.msra.mxu0 %v1241_v4 }
  0x23   : > { %1129 = vmatprep.subr.bf16.mxu0 %v1326_v1 }
  0x26   : > { %1130 = vmatpush3.bf16.msra.mxu0 %v1242_v5 }
  0x27   : > { %1131 = vmatprep.subr.bf16.mxu0 %v1326_v1 }
  0x2a   : > { %1132 = vmatpush3.bf16.msra.mxu0 %v1243_v6 }
  0x2b   : > { %1133 = vmatprep.subr.bf16.mxu0 %v1326_v1 }
  0x2e   : > { %1134 = vmatpush3.bf16.msra.mxu0 %v1244_v7 }
  0x2f   : > { %1135 = vmatprep.subr.bf16.mxu0 %v1326_v1 }
  0x32   : > { %1136 = vmatpush3.bf16.msra.mxu0 %v1245_v8 }
  0x35   : > { %1138 = vmatmul.mubr.bf16.vlgmr.msra.gmra.mrb[0].mxu0 %v1246_v9 }
 0x108   : > { %v511_v13 = vpop.f32.mrb[0].mxu0 }
 0x109   : > { %v512_v14 = vadd.f32 %v1039_v12, %v511_v13   ;;  %v1139_v15 = vpop.f32.mrb[1].mxu0 }
 0x10a   : > { %v514_v16 = vpop.f32.mrb[2].mxu0 }
 0x10b   : > { %v515_v17 = vadd.f32 %v1039_v12, %v514_v16   ;;  %v1140_v18 = vpop.f32.mrb[3].mxu0 }
 0x10c LB: >> { %s1083_s19 = sshll.u32 %s1323_s18, 6  ;;  %575 = vadd.xlane.f32.xlu0 %v1319_v14  ;;  %v1328_v20 = vmov 0.0   ;;  %vm1329_vm2 = vmmov 0   ;;  %s529_s29 = scalar_lea.vmem %s1594_s4, %s1323_s18  ;;  %s1323_s18 = sphi %s1458_s18, %s526_s18   ;;  %v1319_v14 = vphi %v512_v14, %v1604_v14   ;;  %v1315_v17 = vphi %v515_v17, %v1603_v17  }
 0x10d   : >> { %s1474_s22 = scalar_lea.vmem %s1596_s6, %s1083_s19  ;;  %s1480_s0 = scalar_lea.vmem %s1598_s8, %s1083_s19  ;;  %1141 = vmatprep.subr.bf16.mxu0 %v1328_v20  ;;  %1161 = vmatprep.subr.bf16.mxu1 %v1328_v20  ;;  %v1052_v46 = vld [vmem:[%s529_s29] ss:$0 sm:$0xff] }
 0x10e   : >> { %v1247_v19 = vld [vmem:[%s1474_s22] sm:$0xff]   ;;  %v1248_v31 = vld [vmem:[%s1474_s22 + $0x8] sm:$0xff]   ;;  %v1249_v32 = vld [vmem:[%s1474_s22 + $0x10] sm:$0xff]   ;;  %1157 = vmatprep.mubr.msk.bf16.mxu0 %vm1329_vm2, %v1328_v20  ;;  %1177 = vmatprep.mubr.msk.bf16.mxu1 %vm1329_vm2, %v1328_v20  ;;  %s531_s14 = scalar_lea.vmem %s1595_s5, %s1323_s18  ;;  %s552_s17 = scalar_lea.vmem %s1597_s7, %s1323_s18 }
 0x10f   : >> { %1142 = vmatpush3.bf16.msra.mxu0 %v1247_v19  ;;  %v1250_v33 = vld [vmem:[%s1474_s22 + $0x18] sm:$0xff]   ;;  %v1251_v34 = vld [vmem:[%s1474_s22 + $0x20] sm:$0xff]   ;;  %v1252_v35 = vld [vmem:[%s1474_s22 + $0x28] sm:$0xff]   ;;  %s574_s19 = sld [smem:[#allocation3 + %s1323_s18]] }
 0x110   : >> { %577 = vadd.xlane.f32.xlu0 %v1315_v17  ;;  %1143 = vmatprep.subr.bf16.mxu0 %v1328_v20  ;;  %v1253_v36 = vld [vmem:[%s1474_s22 + $0x30] sm:$0xff]   ;;  %v1254_v37 = vld [vmem:[%s1474_s22 + $0x38] sm:$0xff]   ;;  %v1053_v50 = vld [vmem:[%s531_s14] ss:$0 sm:$0xff]  ;;  %s572_s22 = scalar_lea.vmem %s1599_s9, %s1323_s18  ;;  %s526_s18 = sadd.s32 1, %s1323_s18  }
 0x111   : >> { %v1255_v55 = vld [vmem:[%s1480_s0] sm:$0xff]   ;;  %v1256_v56 = vld [vmem:[%s1480_s0 + $0x8] sm:$0xff]   ;;  %v1257_v57 = vld [vmem:[%s1480_s0 + $0x10] sm:$0xff]   ;;  %p523_p9 = scmp.ge.s32.totalorder %s526_s18, 2  }
 0x112   : >> { %1162 = vmatpush3.bf16.msra.mxu1 %v1255_v55  ;;  %v1258_v58 = vld [vmem:[%s1480_s0 + $0x18] sm:$0xff]   ;;  %v1259_v59 = vld [vmem:[%s1480_s0 + $0x20] sm:$0xff]   ;;  %v1260_v60 = vld [vmem:[%s1480_s0 + $0x28] sm:$0xff]  }
 0x113   : >> { %1144 = vmatpush3.bf16.msra.mxu0 %v1248_v31  ;;  %1163 = vmatprep.subr.bf16.mxu1 %v1328_v20  ;;  %v1261_v61 = vld [vmem:[%s1480_s0 + $0x30] sm:$0xff]   ;;  %v1262_v62 = vld [vmem:[%s1480_s0 + $0x38] sm:$0xff]   ;;  %v1054_v63 = vld [vmem:[%s552_s17] ss:$0 sm:$0xff] }
 0x114   : >> { %1145 = vmatprep.subr.bf16.mxu0 %v1328_v20  ;;  %v1273_v11 = vld [vmem:[%s1600_s10 + $0x10] sm:$0xff] (%p523_p9)  }
 0x116   : >> { %1164 = vmatpush3.bf16.msra.mxu1 %v1256_v56 }
 0x117   : >> { %1146 = vmatpush3.bf16.msra.mxu0 %v1249_v32  ;;  %1165 = vmatprep.subr.bf16.mxu1 %v1328_v20 }
 0x118   : >> { %1147 = vmatprep.subr.bf16.mxu0 %v1328_v20 }
 0x11a   : >> { %1166 = vmatpush3.bf16.msra.mxu1 %v1257_v57 }
 0x11b   : >> { %1148 = vmatpush3.bf16.msra.mxu0 %v1250_v33  ;;  %1167 = vmatprep.subr.bf16.mxu1 %v1328_v20 }
 0x11c   : >> { %1149 = vmatprep.subr.bf16.mxu0 %v1328_v20 }
 0x11e   : >> { %1168 = vmatpush3.bf16.msra.mxu1 %v1258_v58 }
 0x11f   : >> { %1150 = vmatpush3.bf16.msra.mxu0 %v1251_v34  ;;  %1169 = vmatprep.subr.bf16.mxu1 %v1328_v20 }
 0x120   : >> { %1151 = vmatprep.subr.bf16.mxu0 %v1328_v20 }
 0x122   : >> { %1170 = vmatpush3.bf16.msra.mxu1 %v1259_v59 }
 0x123   : >> { %1152 = vmatpush3.bf16.msra.mxu0 %v1252_v35  ;;  %1171 = vmatprep.subr.bf16.mxu1 %v1328_v20 }
 0x124   : >> { %1153 = vmatprep.subr.bf16.mxu0 %v1328_v20 }
 0x126   : >> { %1172 = vmatpush3.bf16.msra.mxu1 %v1260_v60 }
 0x127   : >> { %1154 = vmatpush3.bf16.msra.mxu0 %v1253_v36  ;;  %1173 = vmatprep.subr.bf16.mxu1 %v1328_v20 }
 0x128   : >> { %1155 = vmatprep.subr.bf16.mxu0 %v1328_v20 }
 0x12a   : >> { %1174 = vmatpush3.bf16.msra.mxu1 %v1261_v61 }
 0x12b   : >> { %1156 = vmatpush3.bf16.msra.mxu0 %v1254_v37  ;;  %1175 = vmatprep.subr.bf16.mxu1 %v1328_v20 }
 0x12c   : > { %1181 = vmatprep.subr.bf16.mxu0 (%p523_p9), %v1326_v1 }
 0x12e   : >> { %1176 = vmatpush3.bf16.msra.mxu1 %v1262_v62 }
 0x199   : >> { %v576_v21 = vpop.xlane.xlu0 %575 }
 0x19a   : >> { %v579_v22 = vmul.f32 0.03125, %v576_v21 }
 0x19c   : >> { %v581_v23 = vsub.f32 %v1319_v14, %v579_v22 }
 0x19d   : >> { %v578_v24 = vpop.xlane.xlu0 %577 }
 0x19e   : >> { %v580_v25 = vmul.f32 0.03125, %v578_v24  ;;  %v585_v26 = vsel %vm520_vm1, %v581_v23, 0.0 }
 0x19f   : >> { %v587_v27 = vmul.f32 %v585_v26, %v585_v26 }
 0x1a0   : >> { %v582_v28 = vsub.f32 %v1315_v17, %v580_v25 }
 0x1a1   : >> { %589 = vadd.xlane.f32.xlu1 %v587_v27 }
 0x1a2   : >> { %v586_v29 = vsel %vm520_vm1, %v582_v28, 0.0 }
 0x1a3   : >> { %v588_v30 = vmul.f32 %v586_v29, %v586_v29 }
 0x1a5   : >> { %591 = vadd.xlane.f32.xlu1 %v588_v30  ;;  %v1063_v30 = vld [vmem:[%s572_s22] ss:$0 sm:$0xff] }
 0x22e   : >> { %v590_v38 = vpop.xlane.xlu1 %589 }
 0x22f   : >> { %v593_v39 = vmul.f32 0.03125, %v590_v38 }
 0x231   : >> { %v595_v40 = vadd.f32 1e-05, %v593_v39 }
 0x232   : >> { %v592_v41 = vpop.xlane.xlu1 %591 }
 0x233   : >> { %1263 = vrsqrt.f32 %v595_v40  ;;  %v594_v42 = vmul.f32 0.03125, %v592_v41  ;;  %v1272_v41 = vld [vmem:[%s1600_s10 + $0x8] sm:$0xff] (%p523_p9)  }
 0x235   : >> { %v596_v43 = vadd.f32 1e-05, %v594_v42  ;;  %v1275_v42 = vld [vmem:[%s1600_s10 + $0x20] sm:$0xff] (%p523_p9)  }
 0x237   : >> { %1265 = vrsqrt.f32 %v596_v43  ;;  %v1276_v43 = vld [vmem:[%s1600_s10 + $0x28] sm:$0xff] (%p523_p9)  }
 0x23d   : >> { %v1264_v44 = vpop.eup %1263 }
 0x23e   : >> { %v599_v45 = vmul.f32 %v1264_v44, %v585_v26  ;;  %v1277_v44 = vld [vmem:[%s1600_s10 + $0x30] sm:$0xff] (%p523_p9)  }
 0x240   : >> { %v607_v49 = vmul.f32 %v1052_v46, %v599_v45  ;;  %v1278_v45 = vld [vmem:[%s1600_s10 + $0x38] sm:$0xff] (%p523_p9)  }
 0x241   : >> { %v1266_v47 = vpop.eup %1265 }
 0x242   : >> { %v600_v48 = vmul.f32 %v1266_v47, %v586_v29  ;;  %v615_v52 = vadd.f32 %v1053_v50, %v607_v49  ;;  %v827_v29 = vstv %s574_s19  ;;  %v1072_v47 = vld [vmem:[%s1601_s11] ss:$0 sm:$0xff] (%p523_p9) }
 0x243   : >> { %v828_v31 = vmul.f32 %v1319_v14, %v827_v29  ;;  %v829_v33 = vmul.f32 %v1315_v17, %v827_v29 }
 0x244   : >> { %v608_v51 = vmul.f32 %v1052_v46, %v600_v48 }
 0x246   : >> { %v616_v53 = vadd.f32 %v1053_v50, %v608_v51 }
 0x248   : >> { %v617_v54 = vpack.c.bf16 %v616_v53, %v615_v52 }
 0x24a   : >> { %1158 = vmatmul.mubr.bf16.vlgmr.msra.gmra.mrb[0].mxu0 %v617_v54 }
 0x24b   : > { %1197 = vmatprep.mubr.msk.bf16.mxu0 (%p523_p9), %vm1327_vm0, %v1326_v1 }
 0x31d   : >> { %v706_v0 = vpop.f32.mrb[0].mxu0 }
 0x31e   : >> { %v707_v2 = vadd.f32 %v1054_v63, %v706_v0  ;;  %v1159_v3 = vpop.f32.mrb[1].mxu0 }
 0x31f   : >> { %v709_v4 = vpop.f32.mrb[2].mxu0 }
 0x320   : >> { %v715_v5 = vmul.f32 0.044715, %v707_v2  ;;  %v710_v6 = vadd.f32 %v1054_v63, %v709_v4  ;;  %v1160_v7 = vpop.f32.mrb[3].mxu0  ;;  %v713_v23 = vmul.f32 0.5, %v707_v2 }
 0x322   : >> { %v717_v8 = vmul.f32 %v715_v5, %v707_v2  ;;  %v716_v9 = vmul.f32 0.044715, %v710_v6  ;;  %v714_v24 = vmul.f32 0.5, %v710_v6 }
 0x324   : >> { %v719_v10 = vmul.f32 %v717_v8, %v707_v2  ;;  %v718_v12 = vmul.f32 %v716_v9, %v710_v6 }
 0x326   : >> { %v720_v13 = vmul.f32 %v718_v12, %v710_v6  ;;  %v721_v15 = vadd.f32 %v719_v10, %v707_v2 }
 0x328   : >> { %v722_v16 = vadd.f32 %v720_v13, %v710_v6  ;;  %v723_v18 = vmul.f32 0.7978846, %v721_v15 }
 0x32a   : >> { %v724_v19 = vmul.f32 0.7978846, %v722_v16  ;;  %1267 = vtanh.f32 %v723_v18 }
 0x32c   : >> { %1269 = vtanh.f32 %v724_v19 }
 0x334   : >> { %v1268_v20 = vpop.eup %1267 }
 0x335   : >> { %v727_v21 = vadd.f32 1.0, %v1268_v20 }
 0x336   : >> { %v1270_v22 = vpop.eup %1269 }
 0x337   : >> { %v728_v25 = vadd.f32 1.0, %v1270_v22  ;;  %v729_v26 = vmul.f32 %v727_v21, %v713_v23 }
 0x339   : >> { %v730_v27 = vmul.f32 %v728_v25, %v714_v24 }
 0x33b   : >> { %v731_v28 = vpack.c.bf16 %v730_v27, %v729_v26 }
 0x33d   : >> { %1178 = vmatmul.mubr.bf16.vlgmr.msra.gmra.mrb[0].mxu1 %v731_v28 }
 0x410   : >> { %v820_v32 = vpop.f32.mrb[0].mxu1 }
 0x411   : >> { %v821_v34 = vadd.f32 %v1063_v30, %v820_v32  ;;  %v1179_v35 = vpop.f32.mrb[1].mxu1  ;;  %525 = sbr.rel (!%p523_p9) target bundleno = 268 (0x10c), region = 107 }
 0x412   : >> { %v823_v36 = vpop.f32.mrb[2].mxu1 }
 0x413   : >> { %v830_v37 = vadd.f32 %v828_v31, %v821_v34   ;;  %v824_v38 = vadd.f32 %v1063_v30, %v823_v36  ;;  %v1180_v39 = vpop.f32.mrb[3].mxu1 }
 0x415   : >> { %v831_v40 = vadd.f32 %v829_v33, %v824_v38   ;;  %v1604_v14 = vmov %v830_v37 }
 0x416   : > { %v1271_v14 = vld [vmem:[%s1600_s10] sm:$0xff] (%p523_p9)  }
 0x417   : >> { %v1603_v17 = vmov %v831_v40  ;;  %1182 = vmatpush3.bf16.msra.mxu0 (%p523_p9), %v1271_v14  ;;  %v832_v46 = vpack.c.bf16 (%p523_p9), %v831_v40, %v830_v37 }
 0x418   : > { %1183 = vmatprep.subr.bf16.mxu0 %v1326_v1  ;;  %v1274_v17 = vld [vmem:[%s1600_s10 + $0x18] sm:$0xff]  }
 0x41b   : > { %1184 = vmatpush3.bf16.msra.mxu0 %v1272_v41 }
 0x41c   : > { %1185 = vmatprep.subr.bf16.mxu0 %v1326_v1 }
 0x41f   : > { %1186 = vmatpush3.bf16.msra.mxu0 %v1273_v11 }
 0x420   : > { %1187 = vmatprep.subr.bf16.mxu0 %v1326_v1 }
 0x423   : > { %1188 = vmatpush3.bf16.msra.mxu0 %v1274_v17 }
 0x424   : > { %1189 = vmatprep.subr.bf16.mxu0 %v1326_v1 }
 0x427   : > { %1190 = vmatpush3.bf16.msra.mxu0 %v1275_v42 }
 0x428   : > { %1191 = vmatprep.subr.bf16.mxu0 %v1326_v1 }
 0x42b   : > { %1192 = vmatpush3.bf16.msra.mxu0 %v1276_v43 }
 0x42c   : > { %1193 = vmatprep.subr.bf16.mxu0 %v1326_v1 }
 0x42f   : > { %1194 = vmatpush3.bf16.msra.mxu0 %v1277_v44 }
 0x430   : > { %1195 = vmatprep.subr.bf16.mxu0 %v1326_v1 }
 0x433   : > { %1196 = vmatpush3.bf16.msra.mxu0 %v1278_v45 }
 0x436   : > { %1198 = vmatmul.mubr.bf16.vlgmr.msra.gmra.mrb[0].mxu0 %v832_v46 }
 0x509   : > { %v938_v48 = vpop.f32.mrb[0].mxu0 }
 0x50a   : > { %v939_v49 = vadd.f32 %v1072_v47, %v938_v48  ;;  %v1199_v50 = vpop.f32.mrb[1].mxu0 }
 0x50b   : > { %v941_v51 = vpop.f32.mrb[2].mxu0 }
 0x50c   : > { %945 = vadd.xlane.f32.xlu0 %v939_v49  ;;  %v1200_v52 = vpop.f32.mrb[3].mxu0  ;;  %v942_v53 = vadd.f32 %v1072_v47, %v941_v51 }
 0x510   : > { %947 = vadd.xlane.f32.xlu0 %v942_v53 }
 0x599   : > { %v946_v54 = vpop.xlane.xlu0 %945 }
 0x59a   : > { %v949_v55 = vmul.f32 0.25, %v946_v54 }
 0x59c   : > { %v951_v1 = vsub.f32 %v939_v49, %v949_v55 }
 0x59d   : > { %v948_v56 = vpop.xlane.xlu0 %947 }
 0x59e   : > { %953 = vst [vmem:[%s1426_s23] sm:$0xff] %v951_v1  ;;  %v950_v57 = vmul.f32 0.25, %v948_v56 }
 0x5a0   : > { %v952_v58 = vsub.f32 %v942_v53, %v950_v57 }
 0x5a2   : > { %954 = vst [vmem:[%s1426_s23 + $0x8] sm:$0xff] %v952_v58 }
 0x5a3 PF: > { %s28_s26 = sadd.s32 1, %s1311_s26  }
 0x5a4   : > { %p25_p10 = scmp.ge.s32.totalorder %s28_s26, 4  }
 0x5a6   :  { %27 = sbr.rel (!%p25_p10) target bundleno = 16 (0x10), region = 118 }

// kernel: simplex_residual_mlp.1
= control target key start
LH: loop header
LB: loop body
LE: loop exit
PB: predicated region body
PF: predicated region fallthrough
CT: control target
= control target key end

     0   :  { %s1590_s0 = inlined_call_operand.vmem [shape: f32[2], index: 0, kind: input, shape index: {}]   ;;  %s1591_s1 = inlined_call_operand.vmem [shape: bf16[32,128], index: 1, kind: input, shape index: {}]   ;;  %s1592_s2 = inlined_call_operand.vmem [shape: bf16[128,128], index: 2, kind: input, shape index: {}]   ;;  %s1593_s3 = inlined_call_operand.vmem [shape: f32[1,128], index: 3, kind: input, shape index: {}]   ;;  %s1594_s4 = inlined_call_operand.vmem [shape: f32[2,1,128], index: 4, kind: input, shape index: {}]   ;;  %s1595_s5 = inlined_call_operand.vmem [shape: f32[2,1,128], index: 5, kind: input, shape index: {}]   ;;  %s1596_s6 = inlined_call_operand.vmem [shape: bf16[2,128,128], index: 6, kind: input, shape index: {}]   ;;  %s1597_s7 = inlined_call_operand.vmem [shape: f32[2,1,128], index: 7, kind: input, shape index: {}]   ;;  %s1598_s8 = inlined_call_operand.vmem [shape: bf16[2,128,128], index: 8, kind: input, shape index: {}]   ;;  %s1599_s9 = inlined_call_operand.vmem [shape: f32[2,1,128], index: 9, kind: input, shape index: {}]   ;;  %s1600_s10 = inlined_call_operand.vmem [shape: bf16[128,128], index: 10, kind: input, shape index: {}]   ;;  %s1601_s11 = inlined_call_operand.vmem [shape: f32[1,128], index: 11, kind: input, shape index: {}]   ;;  %s1602_s12 = inlined_call_operand.vmem [shape: f32[32,128], index: 12, kind: output, shape index: {}]  }
   0x1   :  { %s17_s23 = sshll.u32 %s1590_s0, 4  ;;  %s18_s23 = int_to_ptr.vmem [resolvable:$true] %s17_s23 }
   0x2   :  { %s1279_s24 = scalar_lea.vmem %s18_s23, 16  ;;  %p1284_p1 = scmp.lt.s32.totalorder %s18_s23, %s18_s23 }
   0x3   :  { %p1280_p0 = scmp.ne.s32.totalorder %s18_s23, %s1279_s24  ;;  %p1285_p2 = scmp.lt.s32.totalorder %s1279_s24, %s1279_s24 }
   0x5   :  { %p1286_p3 = por %p1285_p2, %p1284_p1 }
   0x7   :  { %p1287_p4 = pnand %p1286_p3, %p1280_p0 }
   0x9   :  { %1290 = shalt.err (!%p1287_p4)  }
   0xa   :  { %s1325_s25 = smov [#allocation3]  }
   0xb   :  { %20 = dma.vmem_to_smem %s18_s23, 16, %s1325_s25, [#allocation2] }
   0xc   :  { %1307 = dma.done.wait [#allocation2], 16 }
   0xd   :  { %1308 = vsyncadd [#allocation2], 4294967280 }
   0xe   :  { %22 = sfence }
   0xf   :  { %s1398_s26 = smov 0  }
  0x10 LB: > { %s1030_s0 = sadd.s32 4294967295, %s1311_s26   ;;  %p1034_p5 = scmp.ge.s32.totalorder %s1311_s26, 1  ;;  %s1311_s26 = sphi %s1398_s26, %s28_s26  }
  0x11   : > { %p345_p6 = scmp.lt.s32.totalorder %s1311_s26, 3 }
  0x13   : > { %p346_p7 = pnand %p1034_p5, %p345_p6 }
  0x14   : > { %v1238_v0 = vld [vmem:[%s1592_s2] sm:$0xff] (!%p346_p7)   ;;  %v1326_v1 = vmov (!%p346_p7), 0.0   ;;  %v1239_v2 = vld [vmem:[%s1592_s2 + $0x8] sm:$0xff] (!%p346_p7)   ;;  %vm1327_vm0 = vmmov (!%p346_p7), 0   ;;  %s1035_s13 = sshll.u32 (!%p346_p7), %s1030_s0, 1  ;;  %v1240_v3 = vld [vmem:[%s1592_s2 + $0x10] sm:$0xff] (!%p346_p7)   ;;  %v518_v10 = vlaneseq (!%p346_p7) }
  0x15   : > { %349 = sbr.rel (%p346_p7) target bundleno = 1443 (0x5a3), region = 64  ;;  %1121 = vmatprep.subr.bf16.mxu0 (!%p346_p7), %v1326_v1  ;;  %1137 = vmatprep.mubr.msk.bf16.mxu0 (!%p346_p7), %vm1327_vm0, %v1326_v1  ;;  %p386_p8 = scmp.lt.s32.totalorder (!%p346_p7), %s1035_s13, 3  ;;  %v1241_v4 = vld [vmem:[%s1592_s2 + $0x18] sm:$0xff] (!%p346_p7)   ;;  %v1242_v5 = vld [vmem:[%s1592_s2 + $0x20] sm:$0xff] (!%p346_p7)   ;;  %v1243_v6 = vld [vmem:[%s1592_s2 + $0x28] sm:$0xff] (!%p346_p7)  }
  0x16   : > { %1122 = vmatpush3.bf16.msra.mxu0 (!%p346_p7), %v1238_v0  ;;  %v1244_v7 = vld [vmem:[%s1592_s2 + $0x30] sm:$0xff] (!%p346_p7)   ;;  %v1245_v8 = vld [vmem:[%s1592_s2 + $0x38] sm:$0xff] (!%p346_p7)   ;;  %v1448_v11 = vand.u32 (!%p346_p7), 127, %v518_v10  ;;  %v1039_v12 = vld [vmem:[%s1593_s3] ss:$0 sm:$0xff] (!%p346_p7)  ;;  %s1458_s18 = smov (!%p346_p7), 0  }
  0x17   : > { %1123 = vmatprep.subr.bf16.mxu0 (!%p346_p7), %v1326_v1 }
  0x18   : > { %vm520_vm1 = vcmp.lt.s32.totalorder (!%p346_p7), %v1448_v11, 32 }
  0x1a   : > { %1124 = vmatpush3.bf16.msra.mxu0 (!%p346_p7), %v1239_v2 }
  0x1b   : > { %1125 = vmatprep.subr.bf16.mxu0 (!%p346_p7), %v1326_v1 }
  0x1c   : > { %s1606_s13 = smov (!%p386_p8, %s1035_s13), 3 }
  0x1d   : > { %s1036_s16 = sshll.u32 %s1606_s13, 2  ;;  %s1038_s20 = sshll.u32 %s1606_s13, 3 }
  0x1e   : > { %s389_s19 = scalar_lea.vmem %s1591_s1, %s1036_s16  ;;  %s1426_s23 = scalar_lea.vmem %s1602_s12, %s1038_s20  ;;  %1126 = vmatpush3.bf16.msra.mxu0 %v1240_v3 }
  0x1f   : > { %1127 = vmatprep.subr.bf16.mxu0 %v1326_v1  ;;  %v1246_v9 = vld [vmem:[%s389_s19] sm:$0xff]  }
  0x22   : > { %1128 = vmatpush3.bf16.msra.mxu0 %v1241_v4 }
  0x23   : > { %1129 = vmatprep.subr.bf16.mxu0 %v1326_v1 }
  0x26   : > { %1130 = vmatpush3.bf16.msra.mxu0 %v1242_v5 }
  0x27   : > { %1131 = vmatprep.subr.bf16.mxu0 %v1326_v1 }
  0x2a   : > { %1132 = vmatpush3.bf16.msra.mxu0 %v1243_v6 }
  0x2b   : > { %1133 = vmatprep.subr.bf16.mxu0 %v1326_v1 }
  0x2e   : > { %1134 = vmatpush3.bf16.msra.mxu0 %v1244_v7 }
  0x2f   : > { %1135 = vmatprep.subr.bf16.mxu0 %v1326_v1 }
  0x32   : > { %1136 = vmatpush3.bf16.msra.mxu0 %v1245_v8 }
  0x35   : > { %1138 = vmatmul.mubr.bf16.vlgmr.msra.gmra.mrb[0].mxu0 %v1246_v9 }
 0x108   : > { %v511_v13 = vpop.f32.mrb[0].mxu0 }
 0x109   : > { %v512_v14 = vadd.f32 %v1039_v12, %v511_v13   ;;  %v1139_v15 = vpop.f32.mrb[1].mxu0 }
 0x10a   : > { %v514_v16 = vpop.f32.mrb[2].mxu0 }
 0x10b   : > { %v515_v17 = vadd.f32 %v1039_v12, %v514_v16   ;;  %v1140_v18 = vpop.f32.mrb[3].mxu0 }
 0x10c LB: >> { %s1083_s19 = sshll.u32 %s1323_s18, 6  ;;  %575 = vadd.xlane.f32.xlu0 %v1319_v14  ;;  %v1328_v20 = vmov 0.0   ;;  %vm1329_vm2 = vmmov 0   ;;  %s529_s29 = scalar_lea.vmem %s1594_s4, %s1323_s18  ;;  %s1323_s18 = sphi %s1458_s18, %s526_s18   ;;  %v1319_v14 = vphi %v512_v14, %v1604_v14   ;;  %v1315_v17 = vphi %v515_v17, %v1603_v17  }
 0x10d   : >> { %s1474_s22 = scalar_lea.vmem %s1596_s6, %s1083_s19  ;;  %s1480_s0 = scalar_lea.vmem %s1598_s8, %s1083_s19  ;;  %1141 = vmatprep.subr.bf16.mxu0 %v1328_v20  ;;  %1161 = vmatprep.subr.bf16.mxu1 %v1328_v20  ;;  %v1052_v46 = vld [vmem:[%s529_s29] ss:$0 sm:$0xff] }
 0x10e   : >> { %v1247_v19 = vld [vmem:[%s1474_s22] sm:$0xff]   ;;  %v1248_v31 = vld [vmem:[%s1474_s22 + $0x8] sm:$0xff]   ;;  %v1249_v32 = vld [vmem:[%s1474_s22 + $0x10] sm:$0xff]   ;;  %1157 = vmatprep.mubr.msk.bf16.mxu0 %vm1329_vm2, %v1328_v20  ;;  %1177 = vmatprep.mubr.msk.bf16.mxu1 %vm1329_vm2, %v1328_v20  ;;  %s531_s14 = scalar_lea.vmem %s1595_s5, %s1323_s18  ;;  %s552_s17 = scalar_lea.vmem %s1597_s7, %s1323_s18 }
 0x10f   : >> { %1142 = vmatpush3.bf16.msra.mxu0 %v1247_v19  ;;  %v1250_v33 = vld [vmem:[%s1474_s22 + $0x18] sm:$0xff]   ;;  %v1251_v34 = vld [vmem:[%s1474_s22 + $0x20] sm:$0xff]   ;;  %v1252_v35 = vld [vmem:[%s1474_s22 + $0x28] sm:$0xff]   ;;  %s574_s19 = sld [smem:[#allocation3 + %s1323_s18]] }
 0x110   : >> { %577 = vadd.xlane.f32.xlu0 %v1315_v17  ;;  %1143 = vmatprep.subr.bf16.mxu0 %v1328_v20  ;;  %v1253_v36 = vld [vmem:[%s1474_s22 + $0x30] sm:$0xff]   ;;  %v1254_v37 = vld [vmem:[%s1474_s22 + $0x38] sm:$0xff]   ;;  %v1053_v50 = vld [vmem:[%s531_s14] ss:$0 sm:$0xff]  ;;  %s572_s22 = scalar_lea.vmem %s1599_s9, %s1323_s18  ;;  %s526_s18 = sadd.s32 1, %s1323_s18  }
 0x111   : >> { %v1255_v55 = vld [vmem:[%s1480_s0] sm:$0xff]   ;;  %v1256_v56 = vld [vmem:[%s1480_s0 + $0x8] sm:$0xff]   ;;  %v1257_v57 = vld [vmem:[%s1480_s0 + $0x10] sm:$0xff]   ;;  %p523_p9 = scmp.ge.s32.totalorder %s526_s18, 2  }
 0x112   : >> { %1162 = vmatpush3.bf16.msra.mxu1 %v1255_v55  ;;  %v1258_v58 = vld [vmem:[%s1480_s0 + $0x18] sm:$0xff]   ;;  %v1259_v59 = vld [vmem:[%s1480_s0 + $0x20] sm:$0xff]   ;;  %v1260_v60 = vld [vmem:[%s1480_s0 + $0x28] sm:$0xff]  }
 0x113   : >> { %1144 = vmatpush3.bf16.msra.mxu0 %v1248_v31  ;;  %1163 = vmatprep.subr.bf16.mxu1 %v1328_v20  ;;  %v1261_v61 = vld [vmem:[%s1480_s0 + $0x30] sm:$0xff]   ;;  %v1262_v62 = vld [vmem:[%s1480_s0 + $0x38] sm:$0xff]   ;;  %v1054_v63 = vld [vmem:[%s552_s17] ss:$0 sm:$0xff] }
 0x114   : >> { %1145 = vmatprep.subr.bf16.mxu0 %v1328_v20  ;;  %v1273_v11 = vld [vmem:[%s1600_s10 + $0x10] sm:$0xff] (%p523_p9)  }
 0x116   : >> { %1164 = vmatpush3.bf16.msra.mxu1 %v1256_v56 }
 0x117   : >> { %1146 = vmatpush3.bf16.msra.mxu0 %v1249_v32  ;;  %1165 = vmatprep.subr.bf16.mxu1 %v1328_v20 }
 0x118   : >> { %1147 = vmatprep.subr.bf16.mxu0 %v1328_v20 }
 0x11a   : >> { %1166 = vmatpush3.bf16.msra.mxu1 %v1257_v57 }
 0x11b   : >> { %1148 = vmatpush3.bf16.msra.mxu0 %v1250_v33  ;;  %1167 = vmatprep.subr.bf16.mxu1 %v1328_v20 }
 0x11c   : >> { %1149 = vmatprep.subr.bf16.mxu0 %v1328_v20 }
 0x11e   : >> { %1168 = vmatpush3.bf16.msra.mxu1 %v1258_v58 }
 0x11f   : >> { %1150 = vmatpush3.bf16.msra.mxu0 %v1251_v34  ;;  %1169 = vmatprep.subr.bf16.mxu1 %v1328_v20 }
 0x120   : >> { %1151 = vmatprep.subr.bf16.mxu0 %v1328_v20 }
 0x122   : >> { %1170 = vmatpush3.bf16.msra.mxu1 %v1259_v59 }
 0x123   : >> { %1152 = vmatpush3.bf16.msra.mxu0 %v1252_v35  ;;  %1171 = vmatprep.subr.bf16.mxu1 %v1328_v20 }
 0x124   : >> { %1153 = vmatprep.subr.bf16.mxu0 %v1328_v20 }
 0x126   : >> { %1172 = vmatpush3.bf16.msra.mxu1 %v1260_v60 }
 0x127   : >> { %1154 = vmatpush3.bf16.msra.mxu0 %v1253_v36  ;;  %1173 = vmatprep.subr.bf16.mxu1 %v1328_v20 }
 0x128   : >> { %1155 = vmatprep.subr.bf16.mxu0 %v1328_v20 }
 0x12a   : >> { %1174 = vmatpush3.bf16.msra.mxu1 %v1261_v61 }
 0x12b   : >> { %1156 = vmatpush3.bf16.msra.mxu0 %v1254_v37  ;;  %1175 = vmatprep.subr.bf16.mxu1 %v1328_v20 }
 0x12c   : > { %1181 = vmatprep.subr.bf16.mxu0 (%p523_p9), %v1326_v1 }
 0x12e   : >> { %1176 = vmatpush3.bf16.msra.mxu1 %v1262_v62 }
 0x199   : >> { %v576_v21 = vpop.xlane.xlu0 %575 }
 0x19a   : >> { %v579_v22 = vmul.f32 0.03125, %v576_v21 }
 0x19c   : >> { %v581_v23 = vsub.f32 %v1319_v14, %v579_v22 }
 0x19d   : >> { %v578_v24 = vpop.xlane.xlu0 %577 }
 0x19e   : >> { %v580_v25 = vmul.f32 0.03125, %v578_v24  ;;  %v585_v26 = vsel %vm520_vm1, %v581_v23, 0.0 }
 0x19f   : >> { %v587_v27 = vmul.f32 %v585_v26, %v585_v26 }
 0x1a0   : >> { %v582_v28 = vsub.f32 %v1315_v17, %v580_v25 }
 0x1a1   : >> { %589 = vadd.xlane.f32.xlu1 %v587_v27 }
 0x1a2   : >> { %v586_v29 = vsel %vm520_vm1, %v582_v28, 0.0 }
 0x1a3   : >> { %v588_v30 = vmul.f32 %v586_v29, %v586_v29 }
 0x1a5   : >> { %591 = vadd.xlane.f32.xlu1 %v588_v30  ;;  %v1063_v30 = vld [vmem:[%s572_s22] ss:$0 sm:$0xff] }
 0x22e   : >> { %v590_v38 = vpop.xlane.xlu1 %589 }
 0x22f   : >> { %v593_v39 = vmul.f32 0.03125, %v590_v38 }
 0x231   : >> { %v595_v40 = vadd.f32 1e-05, %v593_v39 }
 0x232   : >> { %v592_v41 = vpop.xlane.xlu1 %591 }
 0x233   : >> { %1263 = vrsqrt.f32 %v595_v40  ;;  %v594_v42 = vmul.f32 0.03125, %v592_v41  ;;  %v1272_v41 = vld [vmem:[%s1600_s10 + $0x8] sm:$0xff] (%p523_p9)  }
 0x235   : >> { %v596_v43 = vadd.f32 1e-05, %v594_v42  ;;  %v1275_v42 = vld [vmem:[%s1600_s10 + $0x20] sm:$0xff] (%p523_p9)  }
 0x237   : >> { %1265 = vrsqrt.f32 %v596_v43  ;;  %v1276_v43 = vld [vmem:[%s1600_s10 + $0x28] sm:$0xff] (%p523_p9)  }
 0x23d   : >> { %v1264_v44 = vpop.eup %1263 }
 0x23e   : >> { %v599_v45 = vmul.f32 %v1264_v44, %v585_v26  ;;  %v1277_v44 = vld [vmem:[%s1600_s10 + $0x30] sm:$0xff] (%p523_p9)  }
 0x240   : >> { %v607_v49 = vmul.f32 %v1052_v46, %v599_v45  ;;  %v1278_v45 = vld [vmem:[%s1600_s10 + $0x38] sm:$0xff] (%p523_p9)  }
 0x241   : >> { %v1266_v47 = vpop.eup %1265 }
 0x242   : >> { %v600_v48 = vmul.f32 %v1266_v47, %v586_v29  ;;  %v615_v52 = vadd.f32 %v1053_v50, %v607_v49  ;;  %v827_v29 = vstv %s574_s19  ;;  %v1072_v47 = vld [vmem:[%s1601_s11] ss:$0 sm:$0xff] (%p523_p9) }
 0x243   : >> { %v828_v31 = vmul.f32 %v1319_v14, %v827_v29  ;;  %v829_v33 = vmul.f32 %v1315_v17, %v827_v29 }
 0x244   : >> { %v608_v51 = vmul.f32 %v1052_v46, %v600_v48 }
 0x246   : >> { %v616_v53 = vadd.f32 %v1053_v50, %v608_v51 }
 0x248   : >> { %v617_v54 = vpack.c.bf16 %v616_v53, %v615_v52 }
 0x24a   : >> { %1158 = vmatmul.mubr.bf16.vlgmr.msra.gmra.mrb[0].mxu0 %v617_v54 }
 0x24b   : > { %1197 = vmatprep.mubr.msk.bf16.mxu0 (%p523_p9), %vm1327_vm0, %v1326_v1 }
 0x31d   : >> { %v706_v0 = vpop.f32.mrb[0].mxu0 }
 0x31e   : >> { %v707_v2 = vadd.f32 %v1054_v63, %v706_v0  ;;  %v1159_v3 = vpop.f32.mrb[1].mxu0 }
 0x31f   : >> { %v709_v4 = vpop.f32.mrb[2].mxu0 }
 0x320   : >> { %v715_v5 = vmul.f32 0.044715, %v707_v2  ;;  %v710_v6 = vadd.f32 %v1054_v63, %v709_v4  ;;  %v1160_v7 = vpop.f32.mrb[3].mxu0  ;;  %v713_v23 = vmul.f32 0.5, %v707_v2 }
 0x322   : >> { %v717_v8 = vmul.f32 %v715_v5, %v707_v2  ;;  %v716_v9 = vmul.f32 0.044715, %v710_v6  ;;  %v714_v24 = vmul.f32 0.5, %v710_v6 }
 0x324   : >> { %v719_v10 = vmul.f32 %v717_v8, %v707_v2  ;;  %v718_v12 = vmul.f32 %v716_v9, %v710_v6 }
 0x326   : >> { %v720_v13 = vmul.f32 %v718_v12, %v710_v6  ;;  %v721_v15 = vadd.f32 %v719_v10, %v707_v2 }
 0x328   : >> { %v722_v16 = vadd.f32 %v720_v13, %v710_v6  ;;  %v723_v18 = vmul.f32 0.7978846, %v721_v15 }
 0x32a   : >> { %v724_v19 = vmul.f32 0.7978846, %v722_v16  ;;  %1267 = vtanh.f32 %v723_v18 }
 0x32c   : >> { %1269 = vtanh.f32 %v724_v19 }
 0x334   : >> { %v1268_v20 = vpop.eup %1267 }
 0x335   : >> { %v727_v21 = vadd.f32 1.0, %v1268_v20 }
 0x336   : >> { %v1270_v22 = vpop.eup %1269 }
 0x337   : >> { %v728_v25 = vadd.f32 1.0, %v1270_v22  ;;  %v729_v26 = vmul.f32 %v727_v21, %v713_v23 }
 0x339   : >> { %v730_v27 = vmul.f32 %v728_v25, %v714_v24 }
 0x33b   : >> { %v731_v28 = vpack.c.bf16 %v730_v27, %v729_v26 }
 0x33d   : >> { %1178 = vmatmul.mubr.bf16.vlgmr.msra.gmra.mrb[0].mxu1 %v731_v28 }
 0x410   : >> { %v820_v32 = vpop.f32.mrb[0].mxu1 }
 0x411   : >> { %v821_v34 = vadd.f32 %v1063_v30, %v820_v32  ;;  %v1179_v35 = vpop.f32.mrb[1].mxu1  ;;  %525 = sbr.rel (!%p523_p9) target bundleno = 268 (0x10c), region = 107 }
 0x412   : >> { %v823_v36 = vpop.f32.mrb[2].mxu1 }
 0x413   : >> { %v830_v37 = vadd.f32 %v828_v31, %v821_v34   ;;  %v824_v38 = vadd.f32 %v1063_v30, %v823_v36  ;;  %v1180_v39 = vpop.f32.mrb[3].mxu1 }
 0x415   : >> { %v831_v40 = vadd.f32 %v829_v33, %v824_v38   ;;  %v1604_v14 = vmov %v830_v37 }
 0x416   : > { %v1271_v14 = vld [vmem:[%s1600_s10] sm:$0xff] (%p523_p9)  }
 0x417   : >> { %v1603_v17 = vmov %v831_v40  ;;  %1182 = vmatpush3.bf16.msra.mxu0 (%p523_p9), %v1271_v14  ;;  %v832_v46 = vpack.c.bf16 (%p523_p9), %v831_v40, %v830_v37 }
 0x418   : > { %1183 = vmatprep.subr.bf16.mxu0 %v1326_v1  ;;  %v1274_v17 = vld [vmem:[%s1600_s10 + $0x18] sm:$0xff]  }
 0x41b   : > { %1184 = vmatpush3.bf16.msra.mxu0 %v1272_v41 }
 0x41c   : > { %1185 = vmatprep.subr.bf16.mxu0 %v1326_v1 }
 0x41f   : > { %1186 = vmatpush3.bf16.msra.mxu0 %v1273_v11 }
 0x420   : > { %1187 = vmatprep.subr.bf16.mxu0 %v1326_v1 }
 0x423   : > { %1188 = vmatpush3.bf16.msra.mxu0 %v1274_v17 }
 0x424   : > { %1189 = vmatprep.subr.bf16.mxu0 %v1326_v1 }
 0x427   : > { %1190 = vmatpush3.bf16.msra.mxu0 %v1275_v42 }
 0x428   : > { %1191 = vmatprep.subr.bf16.mxu0 %v1326_v1 }
 0x42b   : > { %1192 = vmatpush3.bf16.msra.mxu0 %v1276_v43 }
 0x42c   : > { %1193 = vmatprep.subr.bf16.mxu0 %v1326_v1 }
 0x42f   : > { %1194 = vmatpush3.bf16.msra.mxu0 %v1277_v44 }
 0x430   : > { %1195 = vmatprep.subr.bf16.mxu0 %v1326_v1 }
 0x433   : > { %1196 = vmatpush3.bf16.msra.mxu0 %v1278_v45 }
 0x436   : > { %1198 = vmatmul.mubr.bf16.vlgmr.msra.gmra.mrb[0].mxu0 %v832_v46 }
 0x509   : > { %v938_v48 = vpop.f32.mrb[0].mxu0 }
 0x50a   : > { %v939_v49 = vadd.f32 %v1072_v47, %v938_v48  ;;  %v1199_v50 = vpop.f32.mrb[1].mxu0 }
 0x50b   : > { %v941_v51 = vpop.f32.mrb[2].mxu0 }
 0x50c   : > { %945 = vadd.xlane.f32.xlu0 %v939_v49  ;;  %v1200_v52 = vpop.f32.mrb[3].mxu0  ;;  %v942_v53 = vadd.f32 %v1072_v47, %v941_v51 }
 0x510   : > { %947 = vadd.xlane.f32.xlu0 %v942_v53 }
 0x599   : > { %v946_v54 = vpop.xlane.xlu0 %945 }
 0x59a   : > { %v949_v55 = vmul.f32 0.25, %v946_v54 }
 0x59c   : > { %v951_v1 = vsub.f32 %v939_v49, %v949_v55 }
 0x59d   : > { %v948_v56 = vpop.xlane.xlu0 %947 }
 0x59e   : > { %953 = vst [vmem:[%s1426_s23] sm:$0xff] %v951_v1  ;;  %v950_v57 = vmul.f32 0.25, %v948_v56 }
 0x5a0   : > { %v952_v58 = vsub.f32 %v942_v53, %v950_v57 }
 0x5a2   : > { %954 = vst [vmem:[%s1426_s23 + $0x8] sm:$0xff] %v952_v58 }
 0x5a3 PF: > { %s28_s26 = sadd.s32 1, %s1311_s26  }
 0x5a4   : > { %p25_p10 = scmp.ge.s32.totalorder %s28_s26, 4  }
 0x5a6   :  { %27 = sbr.rel (!%p25_p10) target bundleno = 16 (0x10), region = 118 }

</bundles_post_ra>
